<compile_context>
chip_gen: v7x
topology: tpu7x:2x2x1
jax: 0.10.0
libtpu: 0.0.40
codegen_flags: <defaults>
</compile_context>

<pallas_src>
import numpy as np
import jax
import jax.numpy as jnp
from jax.experimental import pallas as pl
from jax.experimental.pallas import tpu as pltpu

# ---------------- configuration (SARL Net, small synthetic sizes) ------------
B = 32                     # env steps per call (kernel scales to much larger B)
N = 8                      # number of agents (seq)
INPUT_DIM = 16             # per-agent joint-state dim
SELF_STATE_DIM = 6
MLP1_DIMS = (64, 32)       # mlp1: last_relu=True
MLP2_DIMS = (32, 16)       # mlp2
ATT_DIMS = (32, 32, 1)     # attention MLP (input is 2*mlp1[-1] with global state)
WITH_GLOBAL_STATE = True
ACT_HIDDEN = 128
N_ACTIONS = 81

# padded / fused sizes
SELF_PAD = 8               # self-state 6 -> 8 (zero-padded lanes, zero weight rows)
ACT_PAD = 128              # actor logits 81 -> 128 (lane-dense)
NEG_BIG = -1e30            # bias for padded logits -> softmax contribution exactly 0
MAX_BATCH_BLOCK = 16       # env steps per grid step (=128 agent rows through the MXU)


def _round8(n):
    return ((n + 7) // 8) * 8


OUT_COLS = ACT_PAD + _round8(1 + N)        # 128 + 16 = 144

# ----------------------- packed-parameter slab layouts ------------------------
# Every entry starts at an 8-aligned row and lane 0 -> in-kernel slices are
# plain static (sub)tile loads with no relayout.


def _build_layout(specs):
    layout, r = {}, 0
    for name, shape in specs:
        layout[name] = (r, shape)
        r += _round8(shape[0])
    return layout, r


# slab A (64 lanes): mlp1 / mlp2 / attention "trunk" weights (~66 KiB)
_SPECS_A = [
    ("w1a",      (INPUT_DIM, MLP1_DIMS[0])),
    ("b1a",      (1, MLP1_DIMS[0])),
    ("w1b",      (MLP1_DIMS[0], MLP1_DIMS[1])),
    ("b1b",      (1, MLP1_DIMS[1])),
    ("w_m2_a1l", (MLP1_DIMS[1], MLP2_DIMS[0] + ATT_DIMS[0])),   # [mlp2 fc1 | attn fc1 (local)]
    ("b_m2_a1",  (1, MLP2_DIMS[0] + ATT_DIMS[0])),
    ("w2b",      (MLP2_DIMS[0], MLP2_DIMS[1])),
    ("b2b",      (1, MLP2_DIMS[1])),
    ("wa1g",     (MLP1_DIMS[1], ATT_DIMS[0])),                  # attn fc1, global-state half
    ("wa2",      (ATT_DIMS[0], ATT_DIMS[1])),
    ("ba2",      (1, ATT_DIMS[1])),
    ("wa3_row",  (1, ATT_DIMS[1])),                             # (32,1) weight stored as a row
    ("ba3",      (1, 1)),
]
LAYOUT_A, ROWS_A = _build_layout(_SPECS_A)
COLS_A = 64

# slab B (256 lanes): fused actor/value fc1 on [self_state | weighted_feature] (~32 KiB)
_SPECS_B = [
    ("wh1_s", (SELF_PAD, 2 * ACT_HIDDEN)),
    ("wh1_f", (MLP2_DIMS[1], 2 * ACT_HIDDEN)),
    ("bh1",   (1, 2 * ACT_HIDDEN)),
]
LAYOUT_B, ROWS_B = _build_layout(_SPECS_B)
COLS_B = 2 * ACT_HIDDEN

# slab C (128 lanes): actor fc3 (dense 128x128, pads via -1e30 bias) + value fc3 row (~76 KiB)
_SPECS_C = [
    ("wh2a",    (ACT_HIDDEN, ACT_PAD)),
    ("bh2a",    (1, ACT_PAD)),
    ("wv3_row", (1, ACT_HIDDEN)),
    ("bv3",     (1, 1)),
]
LAYOUT_C, ROWS_C = _build_layout(_SPECS_C)
COLS_C = ACT_PAD


# ------------------------------- kernel --------------------------------------
def sarl_kernel(xf_ref, ss_ref, pa_ref, pb_ref, pc_ref, out_ref):
    xf = xf_ref[...]                         # (TB*N, D) f32, reshaped in the wrapper
    ss = ss_ref[...]                         # (TB, 8)   self-state, zero-padded 6 -> 8
    rows = xf.shape[0]
    tb = rows // N

    def pA(name):
        r0, (rr, cc) = LAYOUT_A[name]
        return pa_ref[r0:r0 + rr, 0:cc]

    def pB(name):
        r0, (rr, cc) = LAYOUT_B[name]
        return pb_ref[r0:r0 + rr, 0:cc]

    def pC(name):
        r0, (rr, cc) = LAYOUT_C[name]
        return pc_ref[r0:r0 + rr, 0:cc]

    def relu(v):
        return jnp.maximum(v, 0.0)

    def dot(a, b):
        return jnp.dot(a, b, preferred_element_type=jnp.float32)

    H1 = MLP1_DIMS[1]
    H2a = MLP2_DIMS[0]
    A1, A2, _ = ATT_DIMS

    # ---- mlp1 (last_relu=True) ----
    h = relu(dot(xf, pA("w1a")) + pA("b1a"))                     # (rows, 64)
    m1 = relu(dot(h, pA("w1b")) + pA("b1b"))                     # (rows, 32)

    # ---- fused: mlp2 layer-1 (lanes :32) + attention layer-1 local half (lanes 32:) ----
    f1 = dot(m1, pA("w_m2_a1l")) + pA("b_m2_a1")                 # (rows, 64)

    # ---- global state at batch granularity: mean -> small matmul -> broadcast ----
    m1_mean = jnp.mean(m1.reshape(tb, N, H1), axis=1)            # (tb, 32)
    g = dot(m1_mean, pA("wa1g"))                                 # (tb, 32)
    g = jnp.broadcast_to(g[:, None, :], (tb, N, A1)).reshape(rows, A1)

    # ---- attention MLP ----
    a = relu(f1[:, H2a:] + g)                                    # (rows, 32)
    a = relu(dot(a, pA("wa2")) + pA("ba2"))                      # (rows, 32)
    # score layer (32 -> 1): VPU multiply + lane reduction instead of an N=1 MXU matmul
    sprod = a * pA("wa3_row")                                    # (rows, 32)
    scores = jnp.sum(sprod.reshape(tb, N, A2), axis=-1) + pA("ba3")   # (tb, N)

    # masked-exp normalization (torch: exp(scores) * (scores != 0)); numerically
    # fragile for large scores but matches the reference semantics exactly.
    scores_exp = jnp.exp(scores) * (scores != 0.0).astype(jnp.float32)
    denom = jnp.sum(scores_exp, axis=1, keepdims=True)
    weights = scores_exp * pl.reciprocal(denom, approx=True)     # (tb, N)

    # ---- mlp2 layer-2 and attention-weighted feature pooling ----
    m2 = dot(relu(f1[:, :H2a]), pA("w2b")) + pA("b2b")           # (rows, 16)
    feat = m2.reshape(tb, N, m2.shape[1])
    weighted = jnp.sum(weights[:, :, None] * feat, axis=1)       # (tb, 16)

    # ---- fused actor/value fc1 on joint_state = [self_state | weighted_feature] ----
    hh = relu(dot(ss, pB("wh1_s"))
              + dot(weighted, pB("wh1_f"))
              + pB("bh1"))                                       # (tb, 256) = [act | val]

    # ---- actor fc3: dense 128x128 matmul, pads carry -1e30 bias -> exactly 0 prob ----
    logits = dot(hh[:, :ACT_HIDDEN], pC("wh2a")) + pC("bh2a")    # (tb, 128)
    # TODO(synk): torch.distributions.Categorical has no kernel equivalent;
    #             we emit the softmax probabilities that parameterize it.
    lmax = jnp.max(logits, axis=-1, keepdims=True)
    e = jnp.exp(logits - lmax)
    probs = e * pl.reciprocal(jnp.sum(e, axis=-1, keepdims=True), approx=True)

    # ---- value fc3: degenerate (128,1) matmul as VPU multiply + lane reduction ----
    v = jnp.sum(hh[:, ACT_HIDDEN:] * pC("wv3_row"), axis=-1, keepdims=True) + pC("bv3")

    # ---- packed, lane-dense output: [probs(128) | v(1) | attn weights(N)] ----
    out_ref[:, 0:ACT_PAD] = probs                                # unmasked 128-lane store
    out_ref[:, ACT_PAD:ACT_PAD + 1] = v
    out_ref[:, ACT_PAD + 1:ACT_PAD + 1 + N] = weights
    # remaining pad lanes (ACT_PAD+1+N : OUT_COLS) are never read by the wrapper.


# ------------------------------- wrapper --------------------------------------
def sarl_forward(state, packed):
    pa, pb, pc = packed
    Bn, Nn, D = state.shape
    assert Nn == N and D == INPUT_DIM

    # batch block: largest candidate (multiple of 8) dividing Bn; else one full block.
    TB = Bn
    for cand in (MAX_BATCH_BLOCK, 16, 8):
        if Bn % cand == 0:
            TB = cand
            break

    # layout plumbing done in XLA, outside the kernel
    xf = state.reshape(Bn * Nn, D)                                          # (B*N, D)
    ss = jnp.pad(state[:, 0, :SELF_STATE_DIM],
                 ((0, 0), (0, SELF_PAD - SELF_STATE_DIM)))                  # (B, 8)

    out = pl.pallas_call(
        sarl_kernel,
        out_shape=jax.ShapeDtypeStruct((Bn, OUT_COLS), jnp.float32),
        grid=(Bn // TB,),
        in_specs=[
            pl.BlockSpec((TB * Nn, D), lambda i: (i, 0)),
            pl.BlockSpec((TB, SELF_PAD), lambda i: (i, 0)),
            # weight slabs: constant block index -> fetched once, VMEM-resident
            pl.BlockSpec((ROWS_A, COLS_A), lambda i: (0, 0)),
            pl.BlockSpec((ROWS_B, COLS_B), lambda i: (0, 0)),
            pl.BlockSpec((ROWS_C, COLS_C), lambda i: (0, 0)),
        ],
        out_specs=pl.BlockSpec((TB, OUT_COLS), lambda i: (i, 0)),
        compiler_params=pltpu.CompilerParams(
            dimension_semantics=("parallel",)),   # v7x: split batch grid across both TCs
    )(xf, ss, pa, pb, pc)

    v = out[:, ACT_PAD:ACT_PAD + 1]
    probs = out[:, :N_ACTIONS]
    attw = out[:, ACT_PAD + 1:ACT_PAD + 1 + Nn]
    return v, probs, attw


# --------------------------- parameter init -----------------------------------
def _torch_linear_init(key, fan_in, fan_out):
    """Deterministic stand-in for torch.nn.Linear default init (U[-1/sqrt(in), 1/sqrt(in)])."""
    kw, kb = jax.random.split(key)
    bound = 1.0 / (fan_in ** 0.5)
    w = jax.random.uniform(kw, (fan_in, fan_out), jnp.float32, -bound, bound)
    b = jax.random.uniform(kb, (1, fan_out), jnp.float32, -bound, bound)
    return w, b


def init_params(key):
    keys = jax.random.split(key, 11)
    H1a, H1 = MLP1_DIMS
    H2a, F = MLP2_DIMS
    A1, A2, A3 = ATT_DIMS
    p = {}
    p["w1a"], p["b1a"] = _torch_linear_init(keys[0], INPUT_DIM, H1a)
    p["w1b"], p["b1b"] = _torch_linear_init(keys[1], H1a, H1)
    p["w2a"], p["b2a"] = _torch_linear_init(keys[2], H1, H2a)
    p["w2b"], p["b2b"] = _torch_linear_init(keys[3], H2a, F)
    att_in = 2 * H1 if WITH_GLOBAL_STATE else H1
    p["wa1"], p["ba1"] = _torch_linear_init(keys[4], att_in, A1)
    p["wa2"], p["ba2"] = _torch_linear_init(keys[5], A1, A2)
    p["wa3"], p["ba3"] = _torch_linear_init(keys[6], A2, A3)
    J = F + SELF_STATE_DIM
    p["wact1"], p["bact1"] = _torch_linear_init(keys[7], J, ACT_HIDDEN)
    w3, b3 = _torch_linear_init(keys[8], ACT_HIDDEN, N_ACTIONS)
    p["wact3"], p["bact3"] = w3 * 0.1, b3     # act_fc3.weight.data.mul_(0.1) (in-place in torch)
    p["wval1"], p["bval1"] = _torch_linear_init(keys[9], J, ACT_HIDDEN)
    p["wval3"], p["bval3"] = _torch_linear_init(keys[10], ACT_HIDDEN, 1)
    # note: value_fc3.weight.data.mul(0.1) in the reference is NOT in-place -> no-op.
    return p


def pack_params(p):
    """Fuse + pad the torch-layout params into three lane-tight f32 slabs."""
    H1 = MLP1_DIMS[1]

    def fill(buf, layout, name, val):
        r0, (rr, cc) = layout[name]
        v = np.asarray(val, np.float32)
        assert v.shape == (rr, cc), (name, v.shape, (rr, cc))
        buf[r0:r0 + rr, :cc] = v

    # ---- slab A (64-lane trunk) ----
    bufA = np.zeros((ROWS_A, COLS_A), np.float32)
    fill(bufA, LAYOUT_A, "w1a", p["w1a"]); fill(bufA, LAYOUT_A, "b1a", p["b1a"])
    fill(bufA, LAYOUT_A, "w1b", p["w1b"]); fill(bufA, LAYOUT_A, "b1b", p["b1b"])
    # fuse mlp2 fc1 with attention fc1 (local half): both consume mlp1 output.
    fill(bufA, LAYOUT_A, "w_m2_a1l",
         np.concatenate([np.asarray(p["w2a"]), np.asarray(p["wa1"])[:H1]], axis=1))
    fill(bufA, LAYOUT_A, "b_m2_a1",
         np.concatenate([np.asarray(p["b2a"]), np.asarray(p["ba1"])], axis=1))
    fill(bufA, LAYOUT_A, "w2b", p["w2b"]); fill(bufA, LAYOUT_A, "b2b", p["b2b"])
    fill(bufA, LAYOUT_A, "wa1g", np.asarray(p["wa1"])[H1:])
    fill(bufA, LAYOUT_A, "wa2", p["wa2"]); fill(bufA, LAYOUT_A, "ba2", p["ba2"])
    fill(bufA, LAYOUT_A, "wa3_row", np.asarray(p["wa3"]).T)
    fill(bufA, LAYOUT_A, "ba3", p["ba3"])

    # ---- slab B (256-lane fused actor/value fc1); self-state rows padded 6 -> 8 ----
    bufB = np.zeros((ROWS_B, COLS_B), np.float32)
    wh1_s = np.zeros((SELF_PAD, 2 * ACT_HIDDEN), np.float32)
    wh1_s[:SELF_STATE_DIM, :ACT_HIDDEN] = np.asarray(p["wact1"])[:SELF_STATE_DIM]
    wh1_s[:SELF_STATE_DIM, ACT_HIDDEN:] = np.asarray(p["wval1"])[:SELF_STATE_DIM]
    fill(bufB, LAYOUT_B, "wh1_s", wh1_s)
    wh1_f = np.concatenate([np.asarray(p["wact1"])[SELF_STATE_DIM:],
                            np.asarray(p["wval1"])[SELF_STATE_DIM:]], axis=1)
    fill(bufB, LAYOUT_B, "wh1_f", wh1_f)
    fill(bufB, LAYOUT_B, "bh1",
         np.concatenate([np.asarray(p["bact1"]), np.asarray(p["bval1"])], axis=1))

    # ---- slab C (128-lane actor fc3 + value fc3 row) ----
    bufC = np.zeros((ROWS_C, COLS_C), np.float32)
    wh2a = np.zeros((ACT_HIDDEN, ACT_PAD), np.float32)
    wh2a[:, :N_ACTIONS] = np.asarray(p["wact3"])
    fill(bufC, LAYOUT_C, "wh2a", wh2a)
    bh2a = np.full((1, ACT_PAD), NEG_BIG, np.float32)       # pads -> softmax contribution 0
    bh2a[0, :N_ACTIONS] = np.asarray(p["bact3"])[0]
    fill(bufC, LAYOUT_C, "bh2a", bh2a)
    fill(bufC, LAYOUT_C, "wv3_row", np.asarray(p["wval3"]).T)
    fill(bufC, LAYOUT_C, "bv3", p["bval3"])

    return jnp.asarray(bufA), jnp.asarray(bufB), jnp.asarray(bufC)


# --------------------------- pure-JAX reference --------------------------------
def reference_forward(state, p):
    Bn, Nn, D = state.shape
    xf = state.reshape(Bn * Nn, D)
    m1 = jax.nn.relu(jax.nn.relu(xf @ p["w1a"] + p["b1a"]) @ p["w1b"] + p["b1b"])
    m2 = jax.nn.relu(m1 @ p["w2a"] + p["b2a"]) @ p["w2b"] + p["b2b"]
    gs = jnp.mean(m1.reshape(Bn, Nn, -1), axis=1, keepdims=True)
    gs = jnp.broadcast_to(gs, (Bn, Nn, m1.shape[1])).reshape(Bn * Nn, -1)
    att_in = jnp.concatenate([m1, gs], axis=1)
    a = jax.nn.relu(att_in @ p["wa1"] + p["ba1"])
    a = jax.nn.relu(a @ p["wa2"] + p["ba2"])
    scores = (a @ p["wa3"] + p["ba3"]).reshape(Bn, Nn)
    se = jnp.exp(scores) * (scores != 0.0)
    w = se / jnp.sum(se, axis=1, keepdims=True)
    feat = m2.reshape(Bn, Nn, -1)
    wf = jnp.sum(w[:, :, None] * feat, axis=1)
    ss = state[:, 0, :SELF_STATE_DIM]
    joint = jnp.concatenate([ss, wf], axis=1)
    act = jax.nn.relu(joint @ p["wact1"] + p["bact1"])
    probs = jax.nn.softmax(act @ p["wact3"] + p["bact3"], axis=-1)
    v = jax.nn.relu(joint @ p["wval1"] + p["bval1"]) @ p["wval3"] + p["bval3"]
    return v, probs, w


# --------------------------------- main ----------------------------------------
if __name__ == "__main__":
    key = jax.random.PRNGKey(0)
    kstate, kparam = jax.random.split(key)
    state = jax.random.normal(kstate, (B, N, INPUT_DIM), jnp.float32)
    params = init_params(kparam)
    packed = pack_params(params)

    v, probs, attw = sarl_forward(state, packed)
    jax.block_until_ready((v, probs, attw))

    v_r, p_r, w_r = reference_forward(state, params)
    assert v.shape == (B, 1) and probs.shape == (B, N_ACTIONS) and attw.shape == (B, N)
    assert jnp.allclose(v, v_r, atol=1e-3, rtol=1e-3)
    assert jnp.allclose(probs, p_r, atol=1e-3, rtol=1e-3)
    assert jnp.allclose(attw, w_r, atol=1e-3, rtol=1e-3)

    print("KERNEL_OK")
</pallas_src>

<mosaic_0001>
module attributes {stable_mosaic.version = 11 : i64} {
  func.func @sarl_kernel(%arg0: i32, %arg1: memref<128x16xf32, #tpu.memory_space<vmem>>, %arg2: memref<16x8xf32, #tpu.memory_space<vmem>>, %arg3: memref<264x64xf32, #tpu.memory_space<vmem>>, %arg4: memref<32x256xf32, #tpu.memory_space<vmem>>, %arg5: memref<152x128xf32, #tpu.memory_space<vmem>>, %arg6: memref<16x144xf32, #tpu.memory_space<vmem>>) attributes {dimension_semantics = [#tpu.dimension_semantics<parallel>], iteration_bounds = array<i64: 2>, scalar_prefetch = 0 : i64, scratch_operands = 0 : i64, tpu.core_type = #tpu.core_type<tc>, window_params = [{transform_indices = @transform_0, window_bounds = array<i64: 128, 16>}, {transform_indices = @transform_1, window_bounds = array<i64: 16, 8>}, {pipeline_mode = #tpu.pipeline_mode<synchronous>, transform_indices = @transform_2, window_bounds = array<i64: 264, 64>}, {pipeline_mode = #tpu.pipeline_mode<synchronous>, transform_indices = @transform_3, window_bounds = array<i64: 32, 256>}, {pipeline_mode = #tpu.pipeline_mode<synchronous>, transform_indices = @transform_4, window_bounds = array<i64: 152, 128>}, {transform_indices = @transform_5, window_bounds = array<i64: 16, 144>}]} {
    %c0 = arith.constant 0 : index
    %c0_0 = arith.constant 0 : index
    %0 = vector.load %arg1[%c0, %c0_0] : memref<128x16xf32, #tpu.memory_space<vmem>>, vector<128x16xf32>
    %c0_1 = arith.constant 0 : index
    %c0_2 = arith.constant 0 : index
    %1 = vector.load %arg2[%c0_1, %c0_2] : memref<16x8xf32, #tpu.memory_space<vmem>>, vector<16x8xf32>
    %c0_3 = arith.constant 0 : index
    %c0_4 = arith.constant 0 : index
    %2 = vector.load %arg3[%c0_3, %c0_4] : memref<264x64xf32, #tpu.memory_space<vmem>>, vector<16x64xf32>
    %cst = arith.constant dense<0.000000e+00> : vector<128x64xf32>
    %3 = tpu.matmul %0, %2, %cst {dimension_numbers = #tpu.dot_dimension_numbers<[1], [0], [0], [1], [0, 0, 1, 1], [], []>} : vector<128x16xf32>, vector<16x64xf32>, vector<128x64xf32> -> vector<128x64xf32>
    %c16 = arith.constant 16 : index
    %c0_5 = arith.constant 0 : index
    %4 = vector.load %arg3[%c16, %c0_5] : memref<264x64xf32, #tpu.memory_space<vmem>>, vector<1x64xf32>
    %5 = vector.broadcast %4 : vector<1x64xf32> to vector<128x64xf32>
    %6 = arith.addf %3, %5 : vector<128x64xf32>
    %cst_6 = arith.constant 0.000000e+00 : f32
    %7 = vector.broadcast %cst_6 : f32 to vector<128x64xf32>
    %8 = arith.maximumf %6, %7 : vector<128x64xf32>
    %c24 = arith.constant 24 : index
    %c0_7 = arith.constant 0 : index
    %9 = vector.load %arg3[%c24, %c0_7] : memref<264x64xf32, #tpu.memory_space<vmem>>, vector<64x32xf32>
    %cst_8 = arith.constant dense<0.000000e+00> : vector<128x32xf32>
    %10 = tpu.matmul %8, %9, %cst_8 {dimension_numbers = #tpu.dot_dimension_numbers<[1], [0], [0], [1], [0, 0, 1, 1], [], []>} : vector<128x64xf32>, vector<64x32xf32>, vector<128x32xf32> -> vector<128x32xf32>
    %c88 = arith.constant 88 : index
    %c0_9 = arith.constant 0 : index
    %11 = vector.load %arg3[%c88, %c0_9] : memref<264x64xf32, #tpu.memory_space<vmem>>, vector<1x32xf32>
    %12 = vector.broadcast %11 : vector<1x32xf32> to vector<128x32xf32>
    %13 = arith.addf %10, %12 : vector<128x32xf32>
    %cst_10 = arith.constant 0.000000e+00 : f32
    %14 = vector.broadcast %cst_10 : f32 to vector<128x32xf32>
    %15 = arith.maximumf %13, %14 : vector<128x32xf32>
    %c96 = arith.constant 96 : index
    %c0_11 = arith.constant 0 : index
    %16 = vector.load %arg3[%c96, %c0_11] : memref<264x64xf32, #tpu.memory_space<vmem>>, vector<32x64xf32>
    %cst_12 = arith.constant dense<0.000000e+00> : vector<128x64xf32>
    %17 = tpu.matmul %15, %16, %cst_12 {dimension_numbers = #tpu.dot_dimension_numbers<[1], [0], [0], [1], [0, 0, 1, 1], [], []>} : vector<128x32xf32>, vector<32x64xf32>, vector<128x64xf32> -> vector<128x64xf32>
    %c128 = arith.constant 128 : index
    %c0_13 = arith.constant 0 : index
    %18 = vector.load %arg3[%c128, %c0_13] : memref<264x64xf32, #tpu.memory_space<vmem>>, vector<1x64xf32>
    %19 = vector.broadcast %18 : vector<1x64xf32> to vector<128x64xf32>
    %20 = arith.addf %17, %19 : vector<128x64xf32>
    %21 = vector.shape_cast %15 : vector<128x32xf32> to vector<16x8x32xf32>
    %cst_14 = arith.constant dense<0.000000e+00> : vector<16x32xf32>
    %22 = vector.multi_reduction <add>, %21, %cst_14 [1] : vector<16x8x32xf32> to vector<16x32xf32>
    %cst_15 = arith.constant 8.000000e+00 : f32
    %23 = vector.broadcast %cst_15 : f32 to vector<16x32xf32>
    %24 = arith.divf %22, %23 : vector<16x32xf32>
    %c176 = arith.constant 176 : index
    %c0_16 = arith.constant 0 : index
    %25 = vector.load %arg3[%c176, %c0_16] : memref<264x64xf32, #tpu.memory_space<vmem>>, vector<32x32xf32>
    %cst_17 = arith.constant dense<0.000000e+00> : vector<16x32xf32>
    %26 = tpu.matmul %24, %25, %cst_17 {dimension_numbers = #tpu.dot_dimension_numbers<[1], [0], [0], [1], [0, 0, 1, 1], [], []>} : vector<16x32xf32>, vector<32x32xf32>, vector<16x32xf32> -> vector<16x32xf32>
    %27 = vector.shape_cast %26 : vector<16x32xf32> to vector<16x1x32xf32>
    %28 = vector.shape_cast %27 : vector<16x1x32xf32> to vector<16x1x32xf32>
    %29 = vector.broadcast %28 : vector<16x1x32xf32> to vector<16x8x32xf32>
    %30 = vector.shape_cast %29 : vector<16x8x32xf32> to vector<128x32xf32>
    %31 = vector.extract_strided_slice %20 {offsets = [0, 32], sizes = [128, 32], strides = [1, 1]} : vector<128x64xf32> to vector<128x32xf32>
    %32 = arith.addf %31, %30 : vector<128x32xf32>
    %cst_18 = arith.constant 0.000000e+00 : f32
    %33 = vector.broadcast %cst_18 : f32 to vector<128x32xf32>
    %34 = arith.maximumf %32, %33 : vector<128x32xf32>
    %c208 = arith.constant 208 : index
    %c0_19 = arith.constant 0 : index
    %35 = vector.load %arg3[%c208, %c0_19] : memref<264x64xf32, #tpu.memory_space<vmem>>, vector<32x32xf32>
    %cst_20 = arith.constant dense<0.000000e+00> : vector<128x32xf32>
    %36 = tpu.matmul %34, %35, %cst_20 {dimension_numbers = #tpu.dot_dimension_numbers<[1], [0], [0], [1], [0, 0, 1, 1], [], []>} : vector<128x32xf32>, vector<32x32xf32>, vector<128x32xf32> -> vector<128x32xf32>
    %c240 = arith.constant 240 : index
    %c0_21 = arith.constant 0 : index
    %37 = vector.load %arg3[%c240, %c0_21] : memref<264x64xf32, #tpu.memory_space<vmem>>, vector<1x32xf32>
    %38 = vector.broadcast %37 : vector<1x32xf32> to vector<128x32xf32>
    %39 = arith.addf %36, %38 : vector<128x32xf32>
    %cst_22 = arith.constant 0.000000e+00 : f32
    %40 = vector.broadcast %cst_22 : f32 to vector<128x32xf32>
    %41 = arith.maximumf %39, %40 : vector<128x32xf32>
    %c248 = arith.constant 248 : index
    %c0_23 = arith.constant 0 : index
    %42 = vector.load %arg3[%c248, %c0_23] : memref<264x64xf32, #tpu.memory_space<vmem>>, vector<1x32xf32>
    %43 = vector.broadcast %42 : vector<1x32xf32> to vector<128x32xf32>
    %44 = arith.mulf %41, %43 : vector<128x32xf32>
    %45 = vector.shape_cast %44 : vector<128x32xf32> to vector<16x8x32xf32>
    %cst_24 = arith.constant dense<0.000000e+00> : vector<16x8xf32>
    %46 = vector.multi_reduction <add>, %45, %cst_24 [2] : vector<16x8x32xf32> to vector<16x8xf32>
    %c256 = arith.constant 256 : index
    %c0_25 = arith.constant 0 : index
    %47 = vector.load %arg3[%c256, %c0_25] : memref<264x64xf32, #tpu.memory_space<vmem>>, vector<1x1xf32>
    %48 = vector.broadcast %47 : vector<1x1xf32> to vector<16x8xf32>
    %49 = arith.addf %46, %48 : vector<16x8xf32>
    %50 = math.exp %49 : vector<16x8xf32>
    %cst_26 = arith.constant 0.000000e+00 : f32
    %51 = vector.broadcast %cst_26 : f32 to vector<16x8xf32>
    %52 = arith.cmpf one, %49, %51 : vector<16x8xf32>
    %53 = arith.extui %52 : vector<16x8xi1> to vector<16x8xi32>
    %54 = arith.sitofp %53 : vector<16x8xi32> to vector<16x8xf32>
    %55 = arith.mulf %50, %54 : vector<16x8xf32>
    %cst_27 = arith.constant dense<0.000000e+00> : vector<16xf32>
    %56 = vector.multi_reduction <add>, %55, %cst_27 [1] : vector<16x8xf32> to vector<16xf32>
    %57 = vector.shape_cast %56 : vector<16xf32> to vector<16x1xf32>
    %58 = tpu.reciprocal %57 {approx = true} : vector<16x1xf32> -> vector<16x1xf32>
    %59 = vector.broadcast %58 : vector<16x1xf32> to vector<16x8xf32>
    %60 = arith.mulf %55, %59 : vector<16x8xf32>
    %61 = vector.extract_strided_slice %20 {offsets = [0, 0], sizes = [128, 32], strides = [1, 1]} : vector<128x64xf32> to vector<128x32xf32>
    %cst_28 = arith.constant 0.000000e+00 : f32
    %62 = vector.broadcast %cst_28 : f32 to vector<128x32xf32>
    %63 = arith.maximumf %61, %62 : vector<128x32xf32>
    %c136 = arith.constant 136 : index
    %c0_29 = arith.constant 0 : index
    %64 = vector.load %arg3[%c136, %c0_29] : memref<264x64xf32, #tpu.memory_space<vmem>>, vector<32x16xf32>
    %cst_30 = arith.constant dense<0.000000e+00> : vector<128x16xf32>
    %65 = tpu.matmul %63, %64, %cst_30 {dimension_numbers = #tpu.dot_dimension_numbers<[1], [0], [0], [1], [0, 0, 1, 1], [], []>} : vector<128x32xf32>, vector<32x16xf32>, vector<128x16xf32> -> vector<128x16xf32>
    %c168 = arith.constant 168 : index
    %c0_31 = arith.constant 0 : index
    %66 = vector.load %arg3[%c168, %c0_31] : memref<264x64xf32, #tpu.memory_space<vmem>>, vector<1x16xf32>
    %67 = vector.broadcast %66 : vector<1x16xf32> to vector<128x16xf32>
    %68 = arith.addf %65, %67 : vector<128x16xf32>
    %69 = vector.shape_cast %68 : vector<128x16xf32> to vector<16x8x16xf32>
    %70 = vector.shape_cast %60 : vector<16x8xf32> to vector<16x8x1xf32>
    %71 = vector.broadcast %70 : vector<16x8x1xf32> to vector<16x8x16xf32>
    %72 = arith.mulf %71, %69 : vector<16x8x16xf32>
    %cst_32 = arith.constant dense<0.000000e+00> : vector<16x16xf32>
    %73 = vector.multi_reduction <add>, %72, %cst_32 [1] : vector<16x8x16xf32> to vector<16x16xf32>
    %c0_33 = arith.constant 0 : index
    %c0_34 = arith.constant 0 : index
    %74 = vector.load %arg4[%c0_33, %c0_34] : memref<32x256xf32, #tpu.memory_space<vmem>>, vector<8x256xf32>
    %cst_35 = arith.constant dense<0.000000e+00> : vector<16x256xf32>
    %75 = tpu.matmul %1, %74, %cst_35 {dimension_numbers = #tpu.dot_dimension_numbers<[1], [0], [0], [1], [0, 0, 1, 1], [], []>} : vector<16x8xf32>, vector<8x256xf32>, vector<16x256xf32> -> vector<16x256xf32>
    %c8 = arith.constant 8 : index
    %c0_36 = arith.constant 0 : index
    %76 = vector.load %arg4[%c8, %c0_36] : memref<32x256xf32, #tpu.memory_space<vmem>>, vector<16x256xf32>
    %cst_37 = arith.constant dense<0.000000e+00> : vector<16x256xf32>
    %77 = tpu.matmul %73, %76, %cst_37 {dimension_numbers = #tpu.dot_dimension_numbers<[1], [0], [0], [1], [0, 0, 1, 1], [], []>} : vector<16x16xf32>, vector<16x256xf32>, vector<16x256xf32> -> vector<16x256xf32>
    %78 = arith.addf %75, %77 : vector<16x256xf32>
    %c24_38 = arith.constant 24 : index
    %c0_39 = arith.constant 0 : index
    %79 = vector.load %arg4[%c24_38, %c0_39] : memref<32x256xf32, #tpu.memory_space<vmem>>, vector<1x256xf32>
    %80 = vector.broadcast %79 : vector<1x256xf32> to vector<16x256xf32>
    %81 = arith.addf %78, %80 : vector<16x256xf32>
    %cst_40 = arith.constant 0.000000e+00 : f32
    %82 = vector.broadcast %cst_40 : f32 to vector<16x256xf32>
    %83 = arith.maximumf %81, %82 : vector<16x256xf32>
    %84 = vector.extract_strided_slice %83 {offsets = [0, 0], sizes = [16, 128], strides = [1, 1]} : vector<16x256xf32> to vector<16x128xf32>
    %c0_41 = arith.constant 0 : index
    %c0_42 = arith.constant 0 : index
    %85 = vector.load %arg5[%c0_41, %c0_42] : memref<152x128xf32, #tpu.memory_space<vmem>>, vector<128x128xf32>
    %cst_43 = arith.constant dense<0.000000e+00> : vector<16x128xf32>
    %86 = tpu.matmul %84, %85, %cst_43 {dimension_numbers = #tpu.dot_dimension_numbers<[1], [0], [0], [1], [0, 0, 1, 1], [], []>} : vector<16x128xf32>, vector<128x128xf32>, vector<16x128xf32> -> vector<16x128xf32>
    %c128_44 = arith.constant 128 : index
    %c0_45 = arith.constant 0 : index
    %87 = vector.load %arg5[%c128_44, %c0_45] : memref<152x128xf32, #tpu.memory_space<vmem>>, vector<1x128xf32>
    %88 = vector.broadcast %87 : vector<1x128xf32> to vector<16x128xf32>
    %89 = arith.addf %86, %88 : vector<16x128xf32>
    %cst_46 = arith.constant dense<0xFF800000> : vector<16xf32>
    %90 = vector.multi_reduction <maximumf>, %89, %cst_46 [1] : vector<16x128xf32> to vector<16xf32>
    %91 = vector.shape_cast %90 : vector<16xf32> to vector<16x1xf32>
    %92 = vector.broadcast %91 : vector<16x1xf32> to vector<16x128xf32>
    %93 = arith.subf %89, %92 : vector<16x128xf32>
    %94 = math.exp %93 : vector<16x128xf32>
    %cst_47 = arith.constant dense<0.000000e+00> : vector<16xf32>
    %95 = vector.multi_reduction <add>, %94, %cst_47 [1] : vector<16x128xf32> to vector<16xf32>
    %96 = vector.shape_cast %95 : vector<16xf32> to vector<16x1xf32>
    %97 = tpu.reciprocal %96 {approx = true} : vector<16x1xf32> -> vector<16x1xf32>
    %98 = vector.broadcast %97 : vector<16x1xf32> to vector<16x128xf32>
    %99 = arith.mulf %94, %98 : vector<16x128xf32>
    %100 = vector.extract_strided_slice %83 {offsets = [0, 128], sizes = [16, 128], strides = [1, 1]} : vector<16x256xf32> to vector<16x128xf32>
    %c136_48 = arith.constant 136 : index
    %c0_49 = arith.constant 0 : index
    %101 = vector.load %arg5[%c136_48, %c0_49] : memref<152x128xf32, #tpu.memory_space<vmem>>, vector<1x128xf32>
    %102 = vector.broadcast %101 : vector<1x128xf32> to vector<16x128xf32>
    %103 = arith.mulf %100, %102 : vector<16x128xf32>
    %cst_50 = arith.constant dense<0.000000e+00> : vector<16xf32>
    %104 = vector.multi_reduction <add>, %103, %cst_50 [1] : vector<16x128xf32> to vector<16xf32>
    %105 = vector.shape_cast %104 : vector<16xf32> to vector<16x1xf32>
    %c144 = arith.constant 144 : index
    %c0_51 = arith.constant 0 : index
    %106 = vector.load %arg5[%c144, %c0_51] : memref<152x128xf32, #tpu.memory_space<vmem>>, vector<1x1xf32>
    %107 = vector.broadcast %106 : vector<1x1xf32> to vector<16x1xf32>
    %108 = arith.addf %105, %107 : vector<16x1xf32>
    %c0_52 = arith.constant 0 : index
    %c0_53 = arith.constant 0 : index
    %109 = vector.load %arg6[%c0_52, %c0_53] : memref<16x144xf32, #tpu.memory_space<vmem>>, vector<16x128xf32>
    tpu.vector_store %arg6[%c0_52, %c0_53], %99 {strides = array<i32>} : memref<16x144xf32, #tpu.memory_space<vmem>>, vector<16x128xf32>,
    %c0_54 = arith.constant 0 : index
    %c128_55 = arith.constant 128 : index
    %110 = vector.load %arg6[%c0_54, %c128_55] : memref<16x144xf32, #tpu.memory_space<vmem>>, vector<16x1xf32>
    tpu.vector_store %arg6[%c0_54, %c128_55], %108 {strides = array<i32>} : memref<16x144xf32, #tpu.memory_space<vmem>>, vector<16x1xf32>,
    %c0_56 = arith.constant 0 : index
    %c129 = arith.constant 129 : index
    %111 = vector.load %arg6[%c0_56, %c129] : memref<16x144xf32, #tpu.memory_space<vmem>>, vector<16x8xf32>
    tpu.vector_store %arg6[%c0_56, %c129], %60 {strides = array<i32>} : memref<16x144xf32, #tpu.memory_space<vmem>>, vector<16x8xf32>,
    return
  }
  func.func @transform_0(%arg0: i32) -> (i32, i32) {
    %c0_i32 = arith.constant 0 : i32
    %c0_i32_0 = arith.constant 0 : i32
    return %arg0, %c0_i32 : i32, i32
  }
  func.func @transform_1(%arg0: i32) -> (i32, i32) {
    %c0_i32 = arith.constant 0 : i32
    %c0_i32_0 = arith.constant 0 : i32
    return %arg0, %c0_i32 : i32, i32
  }
  func.func @transform_2(%arg0: i32) -> (i32, i32) {
    %c0_i32 = arith.constant 0 : i32
    %c0_i32_0 = arith.constant 0 : i32
    %c0_i32_1 = arith.constant 0 : i32
    return %c0_i32, %c0_i32_0 : i32, i32
  }
  func.func @transform_3(%arg0: i32) -> (i32, i32) {
    %c0_i32 = arith.constant 0 : i32
    %c0_i32_0 = arith.constant 0 : i32
    %c0_i32_1 = arith.constant 0 : i32
    return %c0_i32, %c0_i32_0 : i32, i32
  }
  func.func @transform_4(%arg0: i32) -> (i32, i32) {
    %c0_i32 = arith.constant 0 : i32
    %c0_i32_0 = arith.constant 0 : i32
    %c0_i32_1 = arith.constant 0 : i32
    return %c0_i32, %c0_i32_0 : i32, i32
  }
  func.func @transform_5(%arg0: i32) -> (i32, i32) {
    %c0_i32 = arith.constant 0 : i32
    %c0_i32_0 = arith.constant 0 : i32
    return %arg0, %c0_i32 : i32, i32
  }
}

</mosaic_0001>

<bundles_post_ra>
// kernel: tpu_custom_call.1
= control target key start
LH: loop header
LB: loop body
LE: loop exit
PB: predicated region body
PF: predicated region fallthrough
CT: control target
= control target key end

     0   :  { %10 = vsyncpa [#allocation3], 0  ;;  %s4696_s0 = inlined_call_operand.vmem [shape: f32[256,16], index: 0, kind: input, shape index: {}]   ;;  %s4697_s1 = inlined_call_operand.vmem [shape: f32[32,8], index: 1, kind: input, shape index: {}]   ;;  %s4698_s2 = inlined_call_operand.vmem [shape: f32[264,64], index: 2, kind: input, shape index: {}]   ;;  %s4699_s3 = inlined_call_operand.vmem [shape: f32[32,256], index: 3, kind: input, shape index: {}]   ;;  %s4700_s4 = inlined_call_operand.vmem [shape: f32[152,128], index: 4, kind: input, shape index: {}]   ;;  %s4701_s5 = inlined_call_operand.hbm [shape: f32[32,144], index: 5, kind: output, shape index: {}]  }
   0x1   :  { %12 = vsyncpa [#allocation3 + $0x1], 0  ;;  %s3753_s18 = smov 0   ;;  %s3755_s19 = smov 0  }
   0x2   :  { %s3757_s20 = smov 0   ;;  %s3759_s21 = smov 0  }
   0x3 LB: > { %s3774_s22 = sadd.s32 4294967295, %s3713_s21   ;;  %s3000_s23 = sadd.s32 4294967294, %s3713_s21   ;;  %s3713_s21 = sphi %s3759_s21, %s4707_s21   ;;  %s3709_s20 = sphi %s3757_s20, %s4706_s20   ;;  %s3705_s19 = sphi %s3755_s19, %s4705_s19   ;;  %s3701_s18 = sphi %s3753_s18, %s4704_s18  }
   0x4   : > { %s3778_s24 = sadd.s32 1, %s3713_s21   ;;  %s140_s25 = sadd.s32 1, %s3709_s20 }
   0x5   : > { %s137_s26 = ssub.s32 %s3713_s21, %s3778_s24  ;;  %p150_p0 = scmp.ne.s32.totalorder %s3709_s20, %s3705_s19 }
   0x6   : > { %p138_p1 = scmp.eq.s32.totalorder %s137_s26, 0  ;;  %p151_p2 = scmp.eq.s32.totalorder %s3774_s22, 1 }
   0x7   : > { %p156_p3 = scmp.ne.s32.totalorder %s3705_s19, %s3701_s18  ;;  %p157_p4 = scmp.eq.s32.totalorder %s3000_s23, 1 }
   0x8   : > { %s3789_s27 = scalar_select %p138_p1, %s3709_s20, %s140_s25  }
   0x9   : > { %p3791_p5 = por %p151_p2, %p150_p0  ;;  %p3795_p6 = por %p157_p4, %p156_p3 }
   0xa   : > { %p3003_p7 = scmp.ge.s32.totalorder %s3713_s21, 1  ;;  %p202_p8 = scmp.lt.s32.totalorder %s3713_s21, 3 }
   0xc   : > { %p203_p9 = pnand %p3003_p7, %p202_p8 }
   0xd   : > { %v266_v0 = vld [vmem:[%s4698_s2] sm:$0xff] (!%p203_p9)  ;;  %v267_v1 = vld [vmem:[%s4698_s2 + $0x8] sm:$0xff] (!%p203_p9)  ;;  %s3005_s9 = sshll.u32 (!%p203_p9), %s3774_s22, 4  ;;  %v483_v2 = vld [vmem:[%s4698_s2 + $0x18] sm:$0xff] (!%p203_p9)  ;;  %vm273_vm0 = vcmask (!%p203_p9), 130048   ;;  %vm496_vm1 = vcmask (!%p203_p9), 523264  }
   0xe   : > { %206 = sbr.rel (%p203_p9) target bundleno = 2485 (0x9b5), region = 40  ;;  %v3465_v3 = vpack.c.bf16 (!%p203_p9), %v267_v1, %v266_v0  ;;  %p236_p10 = scmp.lt.s32.totalorder (!%p203_p9), %s3005_s9, 31  ;;  %v484_v4 = vld [vmem:[%s4698_s2 + $0x20] sm:$0xff] (!%p203_p9)  ;;  %v485_v5 = vld [vmem:[%s4698_s2 + $0x28] sm:$0xff] (!%p203_p9)  ;;  %v486_v6 = vld [vmem:[%s4698_s2 + $0x30] sm:$0xff] (!%p203_p9)  ;;  %vm715_vm2 = vcmask (!%p203_p9), 261120  }
   0xf   : > { %v3469_v7 = vpack.c.bf16 (!%p203_p9), %v484_v4, %v483_v2  ;;  %v3473_v8 = vpack.c.bf16 (!%p203_p9), %v486_v6, %v485_v5  ;;  %v487_v9 = vld [vmem:[%s4698_s2 + $0x38] sm:$0xff] (!%p203_p9)  ;;  %v488_v10 = vld [vmem:[%s4698_s2 + $0x40] sm:$0xff] (!%p203_p9)  ;;  %v489_v28 = vld [vmem:[%s4698_s2 + $0x48] sm:$0xff] (!%p203_p9)  ;;  %vm1058_vm3 = vcmask (!%p203_p9), 1041409   ;;  %vm1060_vm4 = vcmask (!%p203_p9), 1042434   ;;  %s3716_s12 = smov (!%p203_p9), 32  }
  0x10   : > { %3466 = vmatprep.subr.bf16.mxu0 (!%p203_p9), %v3465_v3  ;;  %v3477_v11 = vpack.c.bf16 (!%p203_p9), %v488_v10, %v487_v9  ;;  %v490_v29 = vld [vmem:[%s4698_s2 + $0x50] sm:$0xff] (!%p203_p9)  ;;  %v706_v31 = vld [vmem:[%s4698_s2 + $0x60] sm:$0xff] (!%p203_p9)  ;;  %v707_v32 = vld [vmem:[%s4698_s2 + $0x68] sm:$0xff] (!%p203_p9)  ;;  %vm1062_vm5 = vcmask (!%p203_p9), 1043459   ;;  %vm1064_vm6 = vcmask (!%p203_p9), 1044484   ;;  %vm1066_vm7 = vcmask (!%p203_p9), 1045509  }
  0x11   : > { %3468 = vmatpush3.bf16.msra.mxu0 (!%p203_p9), %v3465_v3  ;;  %3470 = vmatprep.subr.bf16.mxu1 (!%p203_p9), %v3469_v7  ;;  %v3481_v30 = vpack.c.bf16 (!%p203_p9), %v490_v29, %v489_v28  ;;  %v3485_v33 = vpack.c.bf16 (!%p203_p9), %v707_v32, %v706_v31  ;;  %v3009_v34 = vld [vmem:[%s4698_s2 + $0x10] ss:$0 sm:$0xff] (!%p203_p9)  ;;  %v2059_v28 = vld [vmem:[%s4698_s2 + $0x88] sm:$0xff] (!%p203_p9)  ;;  %v3921_v31 = vld [vmem:[%s4698_s2 + $0x58] ss:$0 sm:$0xff] (!%p203_p9)  ;;  %vm1068_vm8 = vcmask (!%p203_p9), 1046534  }
  0x12   : > { %3472 = vmatpush3.bf16.msra.mxu1 (!%p203_p9), %v3469_v7  ;;  %v2060_v29 = vld [vmem:[%s4698_s2 + $0x90] sm:$0xff] (!%p203_p9)  ;;  %vm1070_vm9 = vcmask (!%p203_p9), 1047559   ;;  %s3717_s30 = smov (!%p203_p9), 96   ;;  %s3007_s25 = sshll.u32 (!%p203_p9), %s3774_s22, 1 }
  0x13   : > { %3474 = vmatprep.subr.bf16.mxu1 (!%p203_p9), %v3473_v8  ;;  %3486 = vmatprep.subr.bf16.mxu0 (!%p203_p9), %v3485_v33  ;;  %p242_p11 = scmp.lt.s32.totalorder (!%p203_p9), %s3007_s25, 3  ;;  %s3128_s11 = sshll.u32 (!%p203_p9), %s3774_s22, 9 }
  0x14   : > { %s4649_s15 = scalar_lea.hbm (!%p203_p9), %s4701_s5, %s3128_s11  ;;  %s3720_s22 = smov (!%p203_p9), [#allocation2]  }
  0x15   : > { %s4709_s9 = smov (!%p236_p10, %s3005_s9), 31  ;;  %s4711_s25 = smov (!%p242_p11, %s3007_s25), 3 }
  0x16   : > { %s3006_s6 = sshll.u32 %s4709_s9, 3  ;;  %3476 = vmatpush3.bf16.msra.mxu1 %v3473_v8  ;;  %s3008_s26 = sshll.u32 %s4711_s25, 3 }
  0x17   : > { %s3829_s10 = scalar_lea.vmem %s4696_s0, %s3006_s6  ;;  %3478 = vmatprep.subr.bf16.mxu1 %v3477_v11  ;;  %s245_s7 = scalar_lea.vmem %s4697_s1, %s3008_s26 }
  0x18   : > { %v248_v12 = vld [vmem:[%s3829_s10] sm:$0xff]  ;;  %v249_v13 = vld [vmem:[%s3829_s10 + $0x8] sm:$0xff]  ;;  %v250_v14 = vld [vmem:[%s3829_s10 + $0x10] sm:$0xff]  ;;  %s232_s6 = sand.u32 1, %s3705_s19   ;;  %s3655_s23 = sshll.u32 %s3720_s22, 4  ;;  %s3656_s23 = int_to_ptr.vmem [resolvable:$false] %s3655_s23 }
  0x19   : > { %3259 = vmatprep.mubr.msk.f32.mxu0 %vm273_vm0, %v248_v12  ;;  %v251_v15 = vld [vmem:[%s3829_s10 + $0x18] sm:$0xff]  ;;  %v252_v16 = vld [vmem:[%s3829_s10 + $0x20] sm:$0xff]  ;;  %v253_v17 = vld [vmem:[%s3829_s10 + $0x28] sm:$0xff]  ;;  %s4655_s16 = scalar_lea.sflag [#allocation3], %s232_s6  ;;  %s3657_s25 = scalar_lea.vmem %s3656_s23, 1024 }
  0x1a   : > { %3260 = vmatmul.mubr.msk.f32.vlgmr.msra.gmra.mrb[0].mxu0 %vm273_vm0, %v249_v13  ;;  %3480 = vmatpush3.bf16.msra.mxu1 %v3477_v11  ;;  %v254_v18 = vld [vmem:[%s3829_s10 + $0x30] sm:$0xff]  ;;  %v255_v19 = vld [vmem:[%s3829_s10 + $0x38] sm:$0xff]  ;;  %v256_v20 = vld [vmem:[%s3829_s10 + $0x40] sm:$0xff] }
  0x1b   : > { %3262 = vmatprep.mubr.msk.f32.mxu0 %vm273_vm0, %v250_v14  ;;  %v257_v21 = vld [vmem:[%s3829_s10 + $0x48] sm:$0xff]  ;;  %v258_v22 = vld [vmem:[%s3829_s10 + $0x50] sm:$0xff]  ;;  %v259_v23 = vld [vmem:[%s3829_s10 + $0x58] sm:$0xff]  ;;  %3482 = vmatprep.subr.bf16.mxu1 %v3481_v30 }
  0x1c   : > { %v260_v24 = vld [vmem:[%s3829_s10 + $0x60] sm:$0xff]  ;;  %v261_v25 = vld [vmem:[%s3829_s10 + $0x68] sm:$0xff]  ;;  %v262_v26 = vld [vmem:[%s3829_s10 + $0x70] sm:$0xff]  ;;  %3488 = vmatpush3.bf16.msra.mxu0 %v3485_v33 }
  0x1d   : > { %v263_v27 = vld [vmem:[%s3829_s10 + $0x78] sm:$0xff] }
  0x1e   : > { %3263 = vmatmul.mubr.msk.f32.gmra.mrb[2].mxu0 %vm273_vm0, %v251_v15  ;;  %3484 = vmatpush3.bf16.msra.mxu1 %v3481_v30  ;;  %v3509_v30 = vpack.c.bf16 %v2060_v29, %v2059_v28 }
  0x1f   : > { %3265 = vmatprep.mubr.msk.f32.mxu0 %vm273_vm0, %v252_v16 }
  0x22   : > { %3266 = vmatmul.mubr.msk.f32.gmra.mrb[4].mxu0 %vm273_vm0, %v253_v17 }
  0x23   : > { %3268 = vmatprep.mubr.msk.f32.mxu0 %vm273_vm0, %v254_v18 }
  0x26   : > { %3269 = vmatmul.mubr.msk.f32.gmra.mrb[6].mxu0 %vm273_vm0, %v255_v19  ;;  %v708_v19 = vld [vmem:[%s4698_s2 + $0x70] sm:$0xff] }
  0x27   : > { %3271 = vmatprep.mubr.msk.f32.mxu0 %vm273_vm0, %v256_v20  ;;  %v709_v20 = vld [vmem:[%s4698_s2 + $0x78] sm:$0xff] }
  0x2a   : > { %3272 = vmatmul.mubr.msk.f32.gmra.mrb[8].mxu0 %vm273_vm0, %v257_v21  ;;  %v3489_v21 = vpack.c.bf16 %v709_v20, %v708_v19 }
  0x2b   : > { %3274 = vmatprep.mubr.msk.f32.mxu0 %vm273_vm0, %v258_v22  ;;  %v1038_v22 = vld [vmem:[%s4698_s2 + $0xb0] sm:$0xff] }
  0x2c   : > { %3490 = vmatprep.subr.bf16.mxu0 %v3489_v21 }
  0x2d   : > { %3492 = vmatpush3.bf16.msra.mxu0 %v3489_v21 }
  0x2e   : > { %3275 = vmatmul.mubr.msk.f32.gmra.mrb[10].mxu0 %vm273_vm0, %v259_v23  ;;  %v1039_v23 = vld [vmem:[%s4698_s2 + $0xb8] sm:$0xff]  ;;  %3510 = vmatprep.subr.bf16.mxu0 %v3509_v30 }
  0x2f   : > { %3277 = vmatprep.mubr.msk.f32.mxu0 %vm273_vm0, %v260_v24  ;;  %v3493_v24 = vpack.c.bf16 %v1039_v23, %v1038_v22 }
  0x31   : > { %3494 = vmatprep.subr.bf16.mxu1 %v3493_v24 }
  0x32   : > { %3278 = vmatmul.mubr.msk.f32.gmra.mrb[12].mxu0 %vm273_vm0, %v261_v25  ;;  %v1040_v25 = vld [vmem:[%s4698_s2 + $0xc0] sm:$0xff] }
  0x33   : > { %3280 = vmatprep.mubr.msk.f32.mxu0 %vm273_vm0, %v262_v26  ;;  %v1041_v26 = vld [vmem:[%s4698_s2 + $0xc8] sm:$0xff] }
  0x36   : > { %3281 = vmatmul.mubr.msk.f32.gmra.mrb[14].mxu0 %vm273_vm0, %v263_v27  ;;  %v3497_v27 = vpack.c.bf16 %v1041_v26, %v1040_v25 }
  0xed   : > { %v3261_v35 = vpop.f32.mrb[0].mxu0 }
  0xee   : > { %v394_v36 = vadd.f32 %v3261_v35, %v3009_v34  ;;  %v388_v37 = vpop.f32.mrb[1].mxu0 }
  0xef   : > { %v389_v38 = vadd.f32 %v3009_v34, %v388_v37 }
  0xf0   : > { %v468_v41 = vmax.f32 %v394_v36, 0.0 }
  0xf1   : > { %v467_v39 = vmax.f32 %v389_v38, 0.0  ;;  %v3264_v40 = vpop.f32.mrb[2].mxu0 }
  0xf2   : > { %v404_v42 = vadd.f32 %v3264_v40, %v3009_v34  ;;  %v398_v43 = vpop.f32.mrb[3].mxu0 }
  0xf3   : > { %v399_v44 = vadd.f32 %v3009_v34, %v398_v43  ;;  %3299 = vmatprep.mubr.msk.f32.mxu1 %vm496_vm1, %v467_v39 }
  0xf4   : > { %3300 = vmatmul.mubr.msk.f32.vlgmr.msra.gmra.mrb[0].mxu1 %vm496_vm1, %v468_v41  ;;  %v470_v47 = vmax.f32 %v404_v42, 0.0 }
  0xf5   : > { %v469_v45 = vmax.f32 %v399_v44, 0.0  ;;  %v3267_v46 = vpop.f32.mrb[4].mxu0  ;;  %3496 = vmatpush3.bf16.msra.mxu1 %v3493_v24 }
  0xf6   : > { %v414_v48 = vadd.f32 %v3267_v46, %v3009_v34  ;;  %v408_v49 = vpop.f32.mrb[5].mxu0  ;;  %3498 = vmatprep.subr.bf16.mxu1 %v3497_v27 }
  0xf7   : > { %v409_v50 = vadd.f32 %v3009_v34, %v408_v49  ;;  %3302 = vmatprep.mubr.msk.f32.mxu1 %vm496_vm1, %v469_v45 }
  0xf8   : > { %3303 = vmatmul.mubr.msk.f32.gmra.mrb[2].mxu1 %vm496_vm1, %v470_v47  ;;  %v472_v53 = vmax.f32 %v414_v48, 0.0 }
  0xf9   : > { %v471_v51 = vmax.f32 %v409_v50, 0.0  ;;  %v3270_v52 = vpop.f32.mrb[6].mxu0  ;;  %3500 = vmatpush3.bf16.msra.mxu1 %v3497_v27 }
  0xfa   : > { %v424_v54 = vadd.f32 %v3270_v52, %v3009_v34  ;;  %v418_v55 = vpop.f32.mrb[7].mxu0 }
  0xfb   : > { %v419_v56 = vadd.f32 %v3009_v34, %v418_v55  ;;  %3305 = vmatprep.mubr.msk.f32.mxu1 %vm496_vm1, %v471_v51 }
  0xfc   : > { %3306 = vmatmul.mubr.msk.f32.gmra.mrb[4].mxu1 %vm496_vm1, %v472_v53  ;;  %v474_v59 = vmax.f32 %v424_v54, 0.0 }
  0xfd   : > { %v473_v57 = vmax.f32 %v419_v56, 0.0  ;;  %v3273_v58 = vpop.f32.mrb[8].mxu0 }
  0xfe   : > { %v434_v60 = vadd.f32 %v3273_v58, %v3009_v34  ;;  %v428_v61 = vpop.f32.mrb[9].mxu0 }
  0xff   : > { %v429_v62 = vadd.f32 %v3009_v34, %v428_v61  ;;  %3308 = vmatprep.mubr.msk.f32.mxu1 %vm496_vm1, %v473_v57 }
 0x100   : > { %3309 = vmatmul.mubr.msk.f32.gmra.mrb[6].mxu1 %vm496_vm1, %v474_v59  ;;  %v476_v1 = vmax.f32 %v434_v60, 0.0 }
 0x101   : > { %v475_v63 = vmax.f32 %v429_v62, 0.0  ;;  %v3276_v0 = vpop.f32.mrb[10].mxu0 }
 0x102   : > { %v444_v2 = vadd.f32 %v3276_v0, %v3009_v34  ;;  %v438_v3 = vpop.f32.mrb[11].mxu0 }
 0x103   : > { %v439_v4 = vadd.f32 %v3009_v34, %v438_v3  ;;  %3311 = vmatprep.mubr.msk.f32.mxu1 %vm496_vm1, %v475_v63 }
 0x104   : > { %3312 = vmatmul.mubr.msk.f32.gmra.mrb[8].mxu1 %vm496_vm1, %v476_v1  ;;  %v478_v7 = vmax.f32 %v444_v2, 0.0 }
 0x105   : > { %v477_v5 = vmax.f32 %v439_v4, 0.0  ;;  %v3279_v6 = vpop.f32.mrb[12].mxu0 }
 0x106   : > { %v454_v8 = vadd.f32 %v3279_v6, %v3009_v34  ;;  %v448_v9 = vpop.f32.mrb[13].mxu0 }
 0x107   : > { %v449_v10 = vadd.f32 %v3009_v34, %v448_v9  ;;  %3314 = vmatprep.mubr.msk.f32.mxu1 %vm496_vm1, %v477_v5 }
 0x108   : > { %3315 = vmatmul.mubr.msk.f32.gmra.mrb[10].mxu1 %vm496_vm1, %v478_v7  ;;  %v480_v13 = vmax.f32 %v454_v8, 0.0 }
 0x109   : > { %v479_v11 = vmax.f32 %v449_v10, 0.0  ;;  %v3282_v12 = vpop.f32.mrb[14].mxu0 }
 0x10a   : > { %v464_v14 = vadd.f32 %v3282_v12, %v3009_v34  ;;  %v458_v15 = vpop.f32.mrb[15].mxu0 }
 0x10b   : > { %v459_v16 = vadd.f32 %v3009_v34, %v458_v15  ;;  %3317 = vmatprep.mubr.msk.f32.mxu1 %vm496_vm1, %v479_v11 }
 0x10c   : > { %3318 = vmatmul.mubr.msk.f32.gmra.mrb[12].mxu1 %vm496_vm1, %v480_v13  ;;  %v482_v18 = vmax.f32 %v464_v14, 0.0 }
 0x10d   : > { %v481_v17 = vmax.f32 %v459_v16, 0.0 }
 0x10f   : > { %3320 = vmatprep.mubr.msk.f32.mxu1 %vm496_vm1, %v481_v17 }
 0x110   : > { %3321 = vmatmul.mubr.msk.f32.gmra.mrb[14].mxu1 %vm496_vm1, %v482_v18 }
 0x1c7   : > { %v3301_v32 = vpop.f32.mrb[0].mxu1 }
 0x1c8   : > { %v617_v33 = vadd.f32 %v3301_v32, %v3921_v31  ;;  %v611_v34 = vpop.f32.mrb[1].mxu1 }
 0x1c9   : > { %v612_v35 = vadd.f32 %v3921_v31, %v611_v34 }
 0x1ca   : > { %v691_v36 = vmax.f32 %v617_v33, 0.0 }
 0x1cb   : > { %v690_v37 = vmax.f32 %v612_v35, 0.0  ;;  %v3304_v38 = vpop.f32.mrb[2].mxu1 }
 0x1cc   : > { %v916_v39 = vsel %vm715_vm2, %v691_v36, 0.0  ;;  %v627_v40 = vadd.f32 %v3304_v38, %v3921_v31  ;;  %v621_v41 = vpop.f32.mrb[3].mxu1 }
 0x1cd   : > { %v917_v42 = vrot.slane %v916_v39, 4  ;;  %v909_v43 = vsel %vm715_vm2, %v690_v37, 0.0  ;;  %v622_v44 = vadd.f32 %v3921_v31, %v621_v41  ;;  %3331 = vmatprep.mubr.msk.f32.mxu0 %vm715_vm2, %v690_v37 }
 0x1ce   : > { %v910_v45 = vrot.slane %v909_v43, 4  ;;  %v693_v46 = vmax.f32 %v627_v40, 0.0  ;;  %3332 = vmatmul.mubr.msk.f32.vlgmr.msra.gmra.mrb[16].mxu0 %vm715_vm2, %v691_v36 }
 0x1cf   : > { %v918_v47 = vadd.f32 %v917_v42, %v916_v39  ;;  %v692_v48 = vmax.f32 %v622_v44, 0.0  ;;  %v3307_v49 = vpop.f32.mrb[4].mxu1  ;;  %3512 = vmatpush3.bf16.msra.mxu0 %v3509_v30 }
 0x1d0   : > { %v911_v50 = vadd.f32 %v910_v45, %v909_v43  ;;  %v930_v51 = vsel %vm715_vm2, %v693_v46, 0.0  ;;  %v637_v52 = vadd.f32 %v3307_v49, %v3921_v31  ;;  %v631_v53 = vpop.f32.mrb[5].mxu1 }
 0x1d1   : > { %v919_v54 = vrot.slane %v918_v47, 2  ;;  %v931_v55 = vrot.slane %v930_v51, 4  ;;  %v923_v56 = vsel %vm715_vm2, %v692_v48, 0.0  ;;  %v632_v57 = vadd.f32 %v3921_v31, %v631_v53  ;;  %3334 = vmatprep.mubr.msk.f32.mxu0 %vm715_vm2, %v692_v48 }
 0x1d2   : > { %v912_v58 = vrot.slane %v911_v50, 2  ;;  %v924_v59 = vrot.slane %v923_v56, 4  ;;  %v695_v60 = vmax.f32 %v637_v52, 0.0  ;;  %3335 = vmatmul.mubr.msk.f32.gmra.mrb[18].mxu0 %vm715_vm2, %v693_v46 }
 0x1d3   : > { %v920_v61 = vadd.f32 %v919_v54, %v918_v47  ;;  %v932_v62 = vadd.f32 %v931_v55, %v930_v51  ;;  %v694_v63 = vmax.f32 %v632_v57, 0.0  ;;  %v3310_v0 = vpop.f32.mrb[6].mxu1 }
 0x1d4   : > { %v913_v1 = vadd.f32 %v912_v58, %v911_v50  ;;  %v925_v2 = vadd.f32 %v924_v59, %v923_v56  ;;  %v944_v3 = vsel %vm715_vm2, %v695_v60, 0.0  ;;  %v647_v4 = vadd.f32 %v3310_v0, %v3921_v31  ;;  %v641_v5 = vpop.f32.mrb[7].mxu1 }
 0x1d5   : > { %v921_v6 = vrot.slane %v920_v61, 1  ;;  %v933_v7 = vrot.slane %v932_v62, 2  ;;  %v945_v8 = vrot.slane %v944_v3, 4  ;;  %v937_v9 = vsel %vm715_vm2, %v694_v63, 0.0  ;;  %3337 = vmatprep.mubr.msk.f32.mxu0 %vm715_vm2, %v694_v63 }
 0x1d6   : > { %v914_v10 = vrot.slane %v913_v1, 1  ;;  %v926_v11 = vrot.slane %v925_v2, 2  ;;  %v938_v12 = vrot.slane %v937_v9, 4  ;;  %v697_v13 = vmax.f32 %v647_v4, 0.0  ;;  %3338 = vmatmul.mubr.msk.f32.gmra.mrb[20].mxu0 %vm715_vm2, %v695_v60 }
 0x1d7   : > { %v922_v14 = vadd.f32 %v921_v6, %v920_v61  ;;  %v934_v15 = vadd.f32 %v933_v7, %v932_v62  ;;  %v946_v16 = vadd.f32 %v945_v8, %v944_v3  ;;  %v642_v17 = vadd.f32 %v3921_v31, %v641_v5  ;;  %v3313_v18 = vpop.f32.mrb[8].mxu1 }
 0x1d8   : > { %v915_v19 = vadd.f32 %v914_v10, %v913_v1  ;;  %v927_v20 = vadd.f32 %v926_v11, %v925_v2  ;;  %v939_v21 = vadd.f32 %v938_v12, %v937_v9  ;;  %v958_v22 = vsel %vm715_vm2, %v697_v13, 0.0  ;;  %v651_v23 = vpop.f32.mrb[9].mxu1 }
 0x1d9   : > { %v1023_v24 = vmul.f32 0.125, %v922_v14  ;;  %v935_v25 = vrot.slane %v934_v15, 1  ;;  %v947_v26 = vrot.slane %v946_v16, 2  ;;  %v959_v27 = vrot.slane %v958_v22, 4 }
 0x1da   : > { %v1022_v28 = vmul.f32 0.125, %v915_v19  ;;  %v928_v29 = vrot.slane %v927_v20, 1  ;;  %v940_v30 = vrot.slane %v939_v21, 2  ;;  %v696_v32 = vmax.f32 %v642_v17, 0.0 }
 0x1db   : > { %v948_v33 = vadd.f32 %v947_v26, %v946_v16  ;;  %v960_v34 = vadd.f32 %v959_v27, %v958_v22  ;;  %v657_v35 = vadd.f32 %v3313_v18, %v3921_v31  ;;  %v3316_v36 = vpop.f32.mrb[10].mxu1  ;;  %v936_v42 = vadd.f32 %v935_v25, %v934_v15 }
 0x1dc   : > { %v1059_v37 = vsel %vm1058_vm3, %v1023_v24, %v1022_v28  ;;  %v929_v38 = vadd.f32 %v928_v29, %v927_v20  ;;  %v941_v39 = vadd.f32 %v940_v30, %v939_v21  ;;  %v951_v40 = vsel %vm715_vm2, %v696_v32, 0.0  ;;  %3340 = vmatprep.mubr.msk.f32.mxu0 %vm715_vm2, %v696_v32  ;;  %v661_v41 = vpop.f32.mrb[11].mxu1 }
 0x1dd   : > { %v949_v43 = vrot.slane %v948_v33, 1  ;;  %v961_v44 = vrot.slane %v960_v34, 2  ;;  %v952_v45 = vrot.slane %v951_v40, 4  ;;  %3341 = vmatmul.mubr.msk.f32.gmra.mrb[22].mxu0 %vm715_vm2, %v697_v13  ;;  %v699_v48 = vmax.f32 %v657_v35, 0.0 }
 0x1de   : > { %v1024_v46 = vmul.f32 0.125, %v929_v38  ;;  %v942_v47 = vrot.slane %v941_v39, 1  ;;  %v652_v49 = vadd.f32 %v3921_v31, %v651_v23  ;;  %v667_v53 = vadd.f32 %v3316_v36, %v3921_v31 }
 0x1df   : > { %v950_v50 = vadd.f32 %v949_v43, %v948_v33  ;;  %v3950_v51 = vadd.f32 %v961_v44, %v960_v34  ;;  %v953_v52 = vadd.f32 %v952_v45, %v951_v40  ;;  %v3319_v54 = vpop.f32.mrb[12].mxu1  ;;  %v972_v56 = vsel %vm715_vm2, %v699_v48, 0.0 }
 0x1e0   : > { %v3954_v55 = vsel %vm1060_vm4, %v1024_v46, %v1059_v37  ;;  %v698_v57 = vmax.f32 %v652_v49, 0.0  ;;  %v671_v58 = vpop.f32.mrb[13].mxu1  ;;  %v3957_v59 = vmul.f32 0.125, %v936_v42  ;;  %v943_v60 = vadd.f32 %v942_v47, %v941_v39 }
 0x1e1   : > { %v954_v61 = vrot.slane %v953_v52, 2  ;;  %v973_v62 = vrot.slane %v972_v56, 4  ;;  %v3959_v63 = vmul.f32 0.125, %v950_v50  ;;  %v701_v1 = vmax.f32 %v667_v53, 0.0 }
 0x1e2   : > { %v965_v0 = vsel %vm715_vm2, %v698_v57, 0.0  ;;  %v662_v2 = vadd.f32 %v3921_v31, %v661_v41  ;;  %3343 = vmatprep.mubr.msk.f32.mxu0 %vm715_vm2, %v698_v57  ;;  %v963_v3 = vrot.slane %v3950_v51, 1  ;;  %v677_v10 = vadd.f32 %v3319_v54, %v3921_v31 }
 0x1e3   : > { %v955_v4 = vadd.f32 %v954_v61, %v953_v52  ;;  %v974_v5 = vadd.f32 %v973_v62, %v972_v56  ;;  %v966_v6 = vrot.slane %v965_v0, 4  ;;  %3344 = vmatmul.mubr.msk.f32.gmra.mrb[24].mxu0 %vm715_vm2, %v699_v48  ;;  %v3322_v7 = vpop.f32.mrb[14].mxu1  ;;  %v986_v8 = vsel %vm715_vm2, %v701_v1, 0.0 }
 0x1e4   : > { %v700_v9 = vmax.f32 %v662_v2, 0.0  ;;  %v672_v11 = vadd.f32 %v3921_v31, %v671_v58  ;;  %v681_v12 = vpop.f32.mrb[15].mxu1  ;;  %v987_v16 = vrot.slane %v986_v8, 4  ;;  %v703_v18 = vmax.f32 %v677_v10, 0.0 }
 0x1e5   : > { %v956_v13 = vrot.slane %v955_v4, 1  ;;  %v975_v14 = vrot.slane %v974_v5, 2  ;;  %v967_v15 = vadd.f32 %v966_v6, %v965_v0  ;;  %v687_v20 = vadd.f32 %v3322_v7, %v3921_v31 }
 0x1e6   : > { %v979_v17 = vsel %vm715_vm2, %v700_v9, 0.0  ;;  %v702_v19 = vmax.f32 %v672_v11, 0.0  ;;  %3346 = vmatprep.mubr.msk.f32.mxu0 %vm715_vm2, %v700_v9  ;;  %v1026_v21 = vmul.f32 0.125, %v943_v60  ;;  %v988_v24 = vadd.f32 %v987_v16, %v986_v8 }
 0x1e7   : > { %v976_v22 = vadd.f32 %v975_v14, %v974_v5  ;;  %v968_v23 = vrot.slane %v967_v15, 2  ;;  %3347 = vmatmul.mubr.msk.f32.gmra.mrb[26].mxu0 %vm715_vm2, %v701_v1  ;;  %v980_v25 = vrot.slane %v979_v17, 4  ;;  %v1000_v26 = vsel %vm715_vm2, %v703_v18, 0.0 }
 0x1e8   : > { %v993_v27 = vsel %vm715_vm2, %v702_v19, 0.0  ;;  %v705_v28 = vmax.f32 %v687_v20, 0.0  ;;  %3349 = vmatprep.mubr.msk.f32.mxu0 %vm715_vm2, %v702_v19  ;;  %v957_v29 = vadd.f32 %v956_v13, %v955_v4  ;;  %v989_v33 = vrot.slane %v988_v24, 2 }
 0x1e9   : > { %v977_v30 = vrot.slane %v976_v22, 1  ;;  %v969_v32 = vadd.f32 %v968_v23, %v967_v15  ;;  %v981_v34 = vadd.f32 %v980_v25, %v979_v17  ;;  %v1001_v35 = vrot.slane %v1000_v26, 4 }
 0x1ea   : > { %v994_v36 = vrot.slane %v993_v27, 4  ;;  %v1014_v37 = vsel %vm715_vm2, %v705_v28, 0.0  ;;  %v990_v40 = vadd.f32 %v989_v33, %v988_v24  ;;  %v682_v45 = vadd.f32 %v3921_v31, %v681_v12  ;;  %v2062_v33 = vld [vmem:[%s4698_s2 + $0xa0] sm:$0xff] }
 0x1eb   : > { %v978_v38 = vadd.f32 %v977_v30, %v976_v22  ;;  %v970_v39 = vrot.slane %v969_v32, 1  ;;  %v1015_v41 = vrot.slane %v1014_v37, 4  ;;  %3350 = vmatmul.mubr.msk.f32.gmra.mrb[28].mxu0 %vm715_vm2, %v703_v18  ;;  %v982_v42 = vrot.slane %v981_v34, 2 }
 0x1ec   : > { %v1002_v43 = vadd.f32 %v1001_v35, %v1000_v26  ;;  %v995_v44 = vadd.f32 %v994_v36, %v993_v27  ;;  %v991_v48 = vrot.slane %v990_v40, 1  ;;  %v704_v54 = vmax.f32 %v682_v45, 0.0  ;;  %v3043_v35 = vld [vmem:[%s4698_s2 + $0x80] ss:$0 sm:$0xff] }
 0x1ed   : > { %v1031_v46 = vmul.f32 0.125, %v978_v38  ;;  %v971_v47 = vadd.f32 %v970_v39, %v969_v32  ;;  %v1016_v49 = vadd.f32 %v1015_v41, %v1014_v37  ;;  %v983_v50 = vadd.f32 %v982_v42, %v981_v34  ;;  %v2061_v32 = vld [vmem:[%s4698_s2 + $0x98] sm:$0xff] }
 0x1ee   : > { %v1003_v52 = vrot.slane %v1002_v43, 2  ;;  %v996_v53 = vrot.slane %v995_v44, 2  ;;  %v964_v56 = vadd.f32 %v963_v3, %v3950_v51  ;;  %v1028_v57 = vmul.f32 0.125, %v957_v29  ;;  %3352 = vmatprep.mubr.msk.f32.mxu0 %vm715_vm2, %v704_v54 }
 0x1ef   : > { %v1030_v58 = vmul.f32 0.125, %v971_v47  ;;  %v1017_v60 = vrot.slane %v1016_v49, 2  ;;  %v984_v61 = vrot.slane %v983_v50, 1  ;;  %v1007_v1 = vsel %vm715_vm2, %v704_v54, 0.0  ;;  %3353 = vmatmul.mubr.msk.f32.gmra.mrb[30].mxu0 %vm715_vm2, %v705_v28 }
 0x1f0   : > { %v1004_v62 = vadd.f32 %v1003_v52, %v1002_v43  ;;  %v997_v0 = vadd.f32 %v996_v53, %v995_v44  ;;  %v992_v2 = vadd.f32 %v991_v48, %v990_v40  ;;  %v1008_v5 = vrot.slane %v1007_v1, 4 }
 0x1f1   : > { %v1072_v31 = vsel %vm1058_vm3, %v1031_v46, %v1030_v58  ;;  %v1018_v4 = vadd.f32 %v1017_v60, %v1016_v49  ;;  %v985_v6 = vadd.f32 %v984_v61, %v983_v50  ;;  %v1063_v3 = vsel %vm1062_vm5, %v3957_v59, %v3954_v55 }
 0x1f2   : > { %v1005_v7 = vrot.slane %v1004_v62, 1  ;;  %v998_v51 = vrot.slane %v997_v0, 1  ;;  %v1009_v8 = vadd.f32 %v1008_v5, %v1007_v1  ;;  %v1029_v9 = vmul.f32 0.125, %v964_v56 }
 0x1f3   : > { %v1065_v10 = vsel %vm1064_vm6, %v1026_v21, %v1063_v3  ;;  %v1032_v11 = vmul.f32 0.125, %v985_v6  ;;  %v1033_v15 = vmul.f32 0.125, %v992_v2  ;;  %v1019_v20 = vrot.slane %v1018_v4, 1 }
 0x1f4   : > { %v1006_v12 = vadd.f32 %v1005_v7, %v1004_v62  ;;  %v999_v13 = vadd.f32 %v998_v51, %v997_v0  ;;  %v1067_v14 = vsel %vm1066_vm7, %v3959_v63, %v1065_v10  ;;  %v1010_v16 = vrot.slane %v1009_v8, 2 }
 0x1f5   : > { %v1069_v17 = vsel %vm1068_vm8, %v1028_v57, %v1067_v14  ;;  %v1073_v18 = vsel %vm1060_vm4, %v1032_v11, %v1072_v31  ;;  %v1020_v25 = vadd.f32 %v1019_v20, %v1018_v4  ;;  %v3513_v34 = vpack.c.bf16 %v2062_v33, %v2061_v32 }
 0x1f6   : > { %v1034_v19 = vmul.f32 0.125, %v999_v13  ;;  %v1071_v55 = vsel %vm1070_vm9, %v1029_v9, %v1069_v17  ;;  %v1035_v59 = vmul.f32 0.125, %v1006_v12  ;;  %v1074_v21 = vsel %vm1062_vm5, %v1033_v15, %v1073_v18 }
 0x1f7   : > { %v1011_v22 = vadd.f32 %v1010_v16, %v1009_v8  ;;  %3363 = vmatprep.mubr.msk.f32.mxu1 %vm715_vm2, %v1071_v55  ;;  %v1037_v28 = vmul.f32 0.125, %v1020_v25  ;;  %3514 = vmatprep.subr.bf16.mxu0 %v3513_v34 }
 0x1f8   : > { %v1075_v23 = vsel %vm1064_vm6, %v1034_v19, %v1074_v21  ;;  %3516 = vmatpush3.bf16.msra.mxu0 %v3513_v34 }
 0x1f9   : > { %v1012_v24 = vrot.slane %v1011_v22, 1  ;;  %v1076_v63 = vsel %vm1066_vm7, %v1035_v59, %v1075_v23  ;;  %v3715_v59 = vmov 1966171168  }
 0x1fa   : > { %v1162_v21 = vunpack.c.l.s4 %v3715_v59 }
 0x1fb   : > { %v1013_v26 = vadd.f32 %v1012_v24, %v1011_v22  ;;  %v1164_v22 = vlaneseq }
 0x1fc   : > { %v1163_v23 = vunpack.c.0.s8 %v1162_v21 }
 0x1fd   : > { %v1036_v27 = vmul.f32 0.125, %v1013_v26  ;;  %v4074_v24 = vshrl.u32 %v1164_v22, 7 }
 0x1ff   : > { %v1077_v29 = vsel %vm1068_vm8, %v1036_v27, %v1076_v63  ;;  %v1166_v63 = vsub.s32 %v1163_v23, %v4074_v24 }
 0x200   : > { %v1078_v30 = vsel %vm1070_vm9, %v1037_v28, %v1077_v29  ;;  %v4078_v29 = vsub.s32 0, %v4074_v24 }
 0x201   : > { %3364 = vmatmul.mubr.msk.f32.vlgmr.msra.gmra.mrb[16].mxu1 %vm715_vm2, %v1078_v30 }
 0x2a1   : > { %v3333_v36 = vpop.f32.mrb[16].mxu0 }
 0x2a2   : > { %v4009_v37 = vadd.f32 %v3333_v36, %v3043_v35  ;;  %v830_v38 = vpop.f32.mrb[17].mxu0 }
 0x2a3   : > { %v4011_v39 = vadd.f32 %v3043_v35, %v830_v38 }
 0x2a4   : > { %v2044_v42 = vmax.f32 %v4009_v37, 0.0 }
 0x2a5   : > { %v2043_v40 = vmax.f32 %v4011_v39, 0.0  ;;  %v3336_v41 = vpop.f32.mrb[18].mxu0 }
 0x2a6   : > { %v4015_v43 = vadd.f32 %v3336_v41, %v3043_v35  ;;  %v840_v44 = vpop.f32.mrb[19].mxu0 }
 0x2a7   : > { %v4017_v45 = vadd.f32 %v3043_v35, %v840_v44  ;;  %3406 = vmatprep.mubr.msk.f32.mxu0 %vm715_vm2, %v2043_v40 }
 0x2a8   : > { %3407 = vmatmul.mubr.msk.f32.vlgmr.msra.gmra.mrb[32].mxu0 %vm715_vm2, %v2044_v42  ;;  %v2046_v48 = vmax.f32 %v4015_v43, 0.0 }
 0x2a9   : > { %v2045_v46 = vmax.f32 %v4017_v45, 0.0  ;;  %v3339_v47 = vpop.f32.mrb[20].mxu0 }
 0x2aa   : > { %v4023_v49 = vadd.f32 %v3339_v47, %v3043_v35  ;;  %v850_v50 = vpop.f32.mrb[21].mxu0 }
 0x2ab   : > { %v4025_v52 = vadd.f32 %v3043_v35, %v850_v50  ;;  %3409 = vmatprep.mubr.msk.f32.mxu0 %vm715_vm2, %v2045_v46 }
 0x2ac   : > { %3410 = vmatmul.mubr.msk.f32.gmra.mrb[34].mxu0 %vm715_vm2, %v2046_v48  ;;  %v2048_v54 = vmax.f32 %v4023_v49, 0.0 }
 0x2ad   : > { %v2047_v53 = vmax.f32 %v4025_v52, 0.0 }
 0x2af   : > { %3412 = vmatprep.mubr.msk.f32.mxu0 %vm715_vm2, %v2047_v53 }
 0x2b0   : > { %v3342_v56 = vpop.f32.mrb[22].mxu0  ;;  %3413 = vmatmul.mubr.msk.f32.gmra.mrb[36].mxu0 %vm715_vm2, %v2048_v54 }
 0x2b1   : > { %v4033_v57 = vadd.f32 %v3342_v56, %v3043_v35  ;;  %v860_v58 = vpop.f32.mrb[23].mxu0 }
 0x2b2   : > { %v4035_v60 = vadd.f32 %v3043_v35, %v860_v58 }
 0x2b3   : > { %v2050_v62 = vmax.f32 %v4033_v57, 0.0 }
 0x2b4   : > { %v2049_v61 = vmax.f32 %v4035_v60, 0.0 }
 0x2b6   : > { %v3345_v0 = vpop.f32.mrb[24].mxu0  ;;  %3415 = vmatprep.mubr.msk.f32.mxu0 %vm715_vm2, %v2049_v61 }
 0x2b7   : > { %v4040_v1 = vadd.f32 %v3345_v0, %v3043_v35  ;;  %v870_v31 = vpop.f32.mrb[25].mxu0  ;;  %3416 = vmatmul.mubr.msk.f32.gmra.mrb[38].mxu0 %vm715_vm2, %v2050_v62 }
 0x2b8   : > { %v4043_v2 = vadd.f32 %v3043_v35, %v870_v31 }
 0x2b9   : > { %v2052_v6 = vmax.f32 %v4040_v1, 0.0 }
 0x2ba   : > { %v2051_v4 = vmax.f32 %v4043_v2, 0.0  ;;  %v3348_v5 = vpop.f32.mrb[26].mxu0 }
 0x2bb   : > { %v4047_v7 = vadd.f32 %v3348_v5, %v3043_v35  ;;  %v880_v51 = vpop.f32.mrb[27].mxu0 }
 0x2bc   : > { %v4049_v3 = vadd.f32 %v3043_v35, %v880_v51  ;;  %3418 = vmatprep.mubr.msk.f32.mxu0 %vm715_vm2, %v2051_v4 }
 0x2bd   : > { %3419 = vmatmul.mubr.msk.f32.gmra.mrb[40].mxu0 %vm715_vm2, %v2052_v6  ;;  %v2054_v10 = vmax.f32 %v4047_v7, 0.0 }
 0x2be   : > { %v2053_v8 = vmax.f32 %v4049_v3, 0.0  ;;  %v3351_v9 = vpop.f32.mrb[28].mxu0 }
 0x2bf   : > { %v4055_v11 = vadd.f32 %v3351_v9, %v3043_v35  ;;  %v890_v12 = vpop.f32.mrb[29].mxu0 }
 0x2c0   : > { %v4057_v13 = vadd.f32 %v3043_v35, %v890_v12  ;;  %3421 = vmatprep.mubr.msk.f32.mxu0 %vm715_vm2, %v2053_v8 }
 0x2c1   : > { %3422 = vmatmul.mubr.msk.f32.gmra.mrb[42].mxu0 %vm715_vm2, %v2054_v10  ;;  %v2056_v15 = vmax.f32 %v4055_v11, 0.0 }
 0x2c2   : > { %v2055_v14 = vmax.f32 %v4057_v13, 0.0  ;;  %v3354_v16 = vpop.f32.mrb[30].mxu0 }
 0x2c3   : > { %v4064_v17 = vadd.f32 %v3354_v16, %v3043_v35  ;;  %v900_v18 = vpop.f32.mrb[31].mxu0 }
 0x2c4   : > { %3424 = vmatprep.mubr.msk.f32.mxu0 %vm715_vm2, %v2055_v14  ;;  %v4067_v19 = vadd.f32 %v3043_v35, %v900_v18 }
 0x2c5   : > { %3425 = vmatmul.mubr.msk.f32.gmra.mrb[44].mxu0 %vm715_vm2, %v2056_v15  ;;  %v2058_v55 = vmax.f32 %v4064_v17, 0.0 }
 0x2c6   : > { %v2057_v20 = vmax.f32 %v4067_v19, 0.0 }
 0x2c8   : > { %3427 = vmatprep.mubr.msk.f32.mxu0 %vm715_vm2, %v2057_v20 }
 0x2c9   : > { %3428 = vmatmul.mubr.msk.f32.gmra.mrb[46].mxu0 %vm715_vm2, %v2058_v55 }
 0x2d4   : > { %v3365_v25 = vpop.f32.mrb[16].mxu1 }
 0x2d5   : > { %v1149_v26 = vpop.f32.mrb[17].mxu1  ;;  %v1216_v46 = vrot.slane %v3365_v25, %v1166_v63  ;;  %v1209_v54 = vcombine.high %v3365_v25, %v3365_v25  ;;  %v1403_v25 = vld [vmem:[%s4698_s2 + $0xd8] sm:$0xff] }
 0x2d6   : > { %v1160_v27 = vcombine.high %v1149_v26, %v1149_v26  ;;  %v1167_v28 = vrot.slane %v1149_v26, %v1166_v63 }
 0x2d7   : > { %v1224_v56 = vcombine.high %v1216_v46, %v1216_v46  ;;  %v1232_v62 = vrot.slane %v1216_v46, %v1166_v63  ;;  %v1223_v31 = vrot.slane %v1209_v54, %v1166_v63 }
 0x2d8   : > { %v1175_v30 = vcombine.high %v1167_v28, %v1167_v28  ;;  %v1183_v32 = vrot.slane %v1167_v28, %v1166_v63  ;;  %v1174_v33 = vrot.slane %v1160_v27, %v1166_v63  ;;  %v1404_v27 = vld [vmem:[%s4698_s2 + $0xe0] sm:$0xff]  ;;  %v1405_v28 = vld [vmem:[%s4698_s2 + $0xe8] sm:$0xff] }
 0x2d9   : > { %v1246_v4 = vrot.slane %v1224_v56, %v1166_v63  ;;  %v1254_v6 = vcombine.high %v1232_v62, %v1232_v62  ;;  %v1293_v51 = vrot.slane %v1232_v62, %v4078_v29  ;;  %v1225_v8 = vcombine.high %v1223_v31, %v1223_v31 }
 0x2da   : > { %v1197_v34 = vrot.slane %v1175_v30, %v1166_v63  ;;  %v1261_v35 = vrot.slane %v1183_v32, %v4078_v29  ;;  %v1205_v36 = vcombine.high %v1183_v32, %v1183_v32  ;;  %v1176_v38 = vcombine.high %v1174_v33, %v1174_v33 }
 0x2db   : > { %v1190_v42 = vrot.slane %v1174_v33, %v1166_v63  ;;  %v1297_v9 = vrot.slane %v1246_v4, %v4078_v29  ;;  %v1256_v10 = vcombine.high %v1246_v4, %v1246_v4  ;;  %v1239_v12 = vrot.slane %v1223_v31, %v1166_v63 }
 0x2dc   : > { %1322 = vrot.lane.b32.xlu0 %v1261_v35, %s3716_s12  ;;  %v1269_v40 = vrot.slane %v1205_v36, %v4078_v29  ;;  %v1207_v41 = vcombine.high %v1197_v34, %v1197_v34  ;;  %v1265_v44 = vrot.slane %v1197_v34, %v4078_v29  ;;  %v1204_v48 = vrot.slane %v1176_v38, %v1166_v63 }
 0x2dd   : > { %v1277_v50 = vrot.slane %v1190_v42, %v4078_v29  ;;  %v1206_v53 = vcombine.high %v1190_v42, %v1190_v42  ;;  %v1301_v14 = vrot.slane %v1254_v6, %v4078_v29  ;;  %v1305_v15 = vrot.slane %v1256_v10, %v4078_v29 }
 0x2de   : > { %1326 = vrot.lane.b32.xlu1 %v1269_v40, %s3716_s12  ;;  %v1273_v47 = vrot.slane %v1207_v41, %v4078_v29  ;;  %v1281_v58 = vrot.slane %v1204_v48, %v4078_v29  ;;  %v1208_v61 = vcombine.high %v1204_v48, %v1204_v48  ;;  %v1253_v16 = vrot.slane %v1225_v8, %v1166_v63  ;;  %v1402_v63 = vld [vmem:[%s4698_s2 + $0xd0] sm:$0xff] }
 0x2df   : > { %v1285_v0 = vrot.slane %v1206_v53, %v4078_v29  ;;  %v1309_v18 = vrot.slane %v1239_v12, %v4078_v29  ;;  %v1255_v20 = vcombine.high %v1239_v12, %v1239_v12  ;;  %v3501_v26 = vpack.c.bf16 %v1403_v25, %v1402_v63 }
 0x2e0   : > { %1324 = vrot.lane.b32.xlu0 %v1265_v44, %s3716_s12  ;;  %v1289_v5 = vrot.slane %v1208_v61, %v4078_v29  ;;  %v1313_v55 = vrot.slane %v1253_v16, %v4078_v29  ;;  %v1257_v59 = vcombine.high %v1253_v16, %v1253_v16  ;;  %v3505_v30 = vpack.c.bf16 %v1405_v28, %v1404_v27 }
 0x2e1   : > { %v1317_v21 = vrot.slane %v1255_v20, %v4078_v29  ;;  %3502 = vmatprep.subr.bf16.mxu1 %v3501_v26 }
 0x2e2   : > { %1328 = vrot.lane.b32.xlu1 %v1273_v47, %s3716_s12  ;;  %v1321_v23 = vrot.slane %v1257_v59, %v4078_v29  ;;  %3504 = vmatpush3.bf16.msra.mxu1 %v3501_v26 }
 0x2e3   : > { %3506 = vmatprep.subr.bf16.mxu1 %v3505_v30 }
 0x2e4   : > { %1330 = vrot.lane.b32.xlu0 %v1277_v50, %s3716_s12 }
 0x2e6   : > { %1332 = vrot.lane.b32.xlu1 %v1281_v58, %s3716_s12  ;;  %3508 = vmatpush3.bf16.msra.mxu1 %v3505_v30 }
 0x2e8   : > { %1334 = vrot.lane.b32.xlu0 %v1285_v0, %s3716_s12 }
 0x2ea   : > { %1336 = vrot.lane.b32.xlu1 %v1289_v5, %s3716_s12 }
 0x2ec   : > { %1338 = vrot.lane.b32.xlu0 %v1293_v51, %s3716_s12 }
 0x2ee   : > { %1340 = vrot.lane.b32.xlu1 %v1297_v9, %s3716_s12 }
 0x2f0   : > { %1342 = vrot.lane.b32.xlu0 %v1301_v14, %s3716_s12 }
 0x2f2   : > { %1344 = vrot.lane.b32.xlu1 %v1305_v15, %s3716_s12 }
 0x2f4   : > { %1346 = vrot.lane.b32.xlu0 %v1309_v18, %s3716_s12 }
 0x2f6   : > { %1348 = vrot.lane.b32.xlu1 %v1313_v55, %s3716_s12 }
 0x2f8   : > { %1350 = vrot.lane.b32.xlu0 %v1317_v21, %s3716_s12 }
 0x2fa   : > { %1352 = vrot.lane.b32.xlu1 %v1321_v23, %s3716_s12 }
 0x34e   : > { %v1323_v32 = vpop.permute.xlu0 %1322 }
 0x34f   : > { %v1370_v33 = vadd.f32 %v1323_v32, %v4011_v39 }
 0x350   : > { %v1327_v35 = vpop.permute.xlu1 %1326 }
 0x351   : > { %v1386_v34 = vmax.f32 %v1370_v33, 0.0  ;;  %v1372_v36 = vadd.f32 %v1327_v35, %v4017_v45 }
 0x352   : > { %v1325_v38 = vpop.permute.xlu0 %1324 }
 0x353   : > { %v1371_v40 = vadd.f32 %v1325_v38, %v4009_v37  ;;  %1427 = vrot.lane.b32.xlu0 %v1386_v34, %s3717_s30  ;;  %v1388_v41 = vmax.f32 %v1372_v36, 0.0 }
 0x354   : > { %v1329_v44 = vpop.permute.xlu1 %1328 }
 0x355   : > { %v1387_v42 = vmax.f32 %v1371_v40, 0.0  ;;  %v1373_v46 = vadd.f32 %v1329_v44, %v4015_v43 }
 0x356   : > { %v1331_v47 = vpop.permute.xlu0 %1330 }
 0x357   : > { %v1374_v48 = vadd.f32 %v1331_v47, %v4025_v52  ;;  %1429 = vrot.lane.b32.xlu1 %v1387_v42, %s3717_s30  ;;  %1431 = vrot.lane.b32.xlu0 %v1388_v41, %s3717_s30  ;;  %v1389_v39 = vmax.f32 %v1373_v46, 0.0 }
 0x358   : > { %v1333_v50 = vpop.permute.xlu1 %1332 }
 0x359   : > { %v1390_v45 = vmax.f32 %v1374_v48, 0.0  ;;  %v1375_v37 = vadd.f32 %v1333_v50, %v4023_v49 }
 0x35a   : > { %v1335_v53 = vpop.permute.xlu0 %1334 }
 0x35b   : > { %v1376_v54 = vadd.f32 %v1335_v53, %v4035_v60  ;;  %1433 = vrot.lane.b32.xlu1 %v1389_v39, %s3717_s30  ;;  %1435 = vrot.lane.b32.xlu0 %v1390_v45, %s3717_s30  ;;  %v1391_v43 = vmax.f32 %v1375_v37, 0.0 }
 0x35c   : > { %v1337_v58 = vpop.permute.xlu1 %1336 }
 0x35d   : > { %v1392_v56 = vmax.f32 %v1376_v54, 0.0  ;;  %v1377_v52 = vadd.f32 %v1337_v58, %v4033_v57  ;;  %v4211_v58 = vld [vmem:[%s4698_s2 + $0xf0] ss:$0 sm:$0xff] }
 0x35e   : > { %v1339_v61 = vpop.permute.xlu0 %1338 }
 0x35f   : > { %v1378_v62 = vadd.f32 %v1339_v61, %v4043_v2  ;;  %1437 = vrot.lane.b32.xlu1 %v1391_v43, %s3717_s30  ;;  %1439 = vrot.lane.b32.xlu0 %v1392_v56, %s3717_s30  ;;  %v1393_v49 = vmax.f32 %v1377_v52, 0.0  ;;  %v1721_v43 = vld [vmem:[%s4698_s2 + $0x100] sm:$0x1]  ;;  %v3718_v56 = vmov 0.0  }
 0x360   : > { %v1341_v31 = vpop.permute.xlu1 %1340  ;;  %3557 = vpush %v1721_v43 }
 0x361   : > { %v1394_v0 = vmax.f32 %v1378_v62, 0.0  ;;  %v1379_v60 = vadd.f32 %v1341_v31, %v4040_v1 }
 0x362   : > { %v1343_v4 = vpop.permute.xlu0 %1342 }
 0x363   : > { %v1380_v5 = vadd.f32 %v1343_v4, %v4049_v3  ;;  %1441 = vrot.lane.b32.xlu1 %v1393_v49, %s3717_s30  ;;  %1443 = vrot.lane.b32.xlu0 %v1394_v0, %s3717_s30  ;;  %v1395_v57 = vmax.f32 %v1379_v60, 0.0  ;;  %v4218_v0 = vld [vmem:[%s4698_s2 + $0xf8] ss:$0 sm:$0xff] }
 0x364   : > { %v1345_v51 = vpop.permute.xlu1 %1344 }
 0x365   : > { %v1396_v6 = vmax.f32 %v1380_v5, 0.0  ;;  %v1381_v2 = vadd.f32 %v1345_v51, %v4047_v7 }
 0x366   : > { %v1347_v8 = vpop.permute.xlu0 %1346 }
 0x367   : > { %v1382_v9 = vadd.f32 %v1347_v8, %v4057_v13  ;;  %1445 = vrot.lane.b32.xlu1 %v1395_v57, %s3717_s30  ;;  %1447 = vrot.lane.b32.xlu0 %v1396_v6, %s3717_s30  ;;  %v1397_v1 = vmax.f32 %v1381_v2, 0.0 }
 0x368   : > { %v1349_v12 = vpop.permute.xlu1 %1348 }
 0x369   : > { %v1398_v10 = vmax.f32 %v1382_v9, 0.0  ;;  %v1383_v3 = vadd.f32 %v1349_v12, %v4055_v11 }
 0x36a   : > { %v1351_v14 = vpop.permute.xlu0 %1350 }
 0x36b   : > { %v1384_v15 = vadd.f32 %v1351_v14, %v4067_v19  ;;  %1449 = vrot.lane.b32.xlu1 %v1397_v1, %s3717_s30  ;;  %1451 = vrot.lane.b32.xlu0 %v1398_v10, %s3717_s30  ;;  %v1399_v7 = vmax.f32 %v1383_v3, 0.0 }
 0x36c   : > { %v1353_v18 = vpop.permute.xlu1 %1352 }
 0x36d   : > { %v1400_v16 = vmax.f32 %v1384_v15, 0.0  ;;  %v1385_v13 = vadd.f32 %v1353_v18, %v4064_v17 }
 0x36f   : > { %1453 = vrot.lane.b32.xlu1 %v1399_v7, %s3717_s30  ;;  %1455 = vrot.lane.b32.xlu0 %v1400_v16, %s3717_s30  ;;  %v1401_v20 = vmax.f32 %v1385_v13, 0.0 }
 0x373   : > { %1457 = vrot.lane.b32.xlu1 %v1401_v20, %s3717_s30 }
 0x37b   : > { %v4156_v11 = vpop.f32.mrb[32].mxu0 }
 0x37c   : > { %v4158_v55 = vpop.f32.mrb[33].mxu0 }
 0x37f   : > { %v4160_v19 = vpop.f32.mrb[34].mxu0 }
 0x380   : > { %v4162_v59 = vpop.f32.mrb[35].mxu0 }
 0x383   : > { %v4164_v21 = vpop.f32.mrb[36].mxu0 }
 0x384   : > { %v4166_v23 = vpop.f32.mrb[37].mxu0 }
 0x38a   : > { %v4168_v17 = vpop.f32.mrb[38].mxu0 }
 0x38b   : > { %v4170_v63 = vpop.f32.mrb[39].mxu0 }
 0x390   : > { %v4172_v25 = vpop.f32.mrb[40].mxu0 }
 0x391   : > { %v4174_v26 = vpop.f32.mrb[41].mxu0  ;;  %s3558_s12 = spop %3557 }
 0x394   : > { %v4176_v27 = vpop.f32.mrb[42].mxu0 }
 0x395   : > { %v4178_v28 = vpop.f32.mrb[43].mxu0 }
 0x398   : > { %v4180_v30 = vpop.f32.mrb[44].mxu0 }
 0x399   : > { %v4182_v32 = vpop.f32.mrb[45].mxu0 }
 0x39c   : > { %v4184_v33 = vpop.f32.mrb[46].mxu0 }
 0x39d   : > { %v4186_v34 = vpop.f32.mrb[47].mxu0 }
 0x3c5   : > { %v1428_v35 = vpop.permute.xlu0 %1427 }
 0x3c6   : > { %3374 = vmatprep.mubr.msk.f32.mxu1 %vm715_vm2, %v1428_v35 }
 0x3c9   : > { %v1430_v36 = vpop.permute.xlu1 %1429  ;;  %v1432_v38 = vpop.permute.xlu0 %1431 }
 0x3ca   : > { %3375 = vmatmul.mubr.msk.f32.vlgmr.msra.gmra.mrb[18].mxu1 %vm715_vm2, %v1430_v36 }
 0x3cb   : > { %3377 = vmatprep.mubr.msk.f32.mxu1 %vm715_vm2, %v1432_v38 }
 0x3cd   : > { %v1434_v40 = vpop.permute.xlu1 %1433  ;;  %v1436_v41 = vpop.permute.xlu0 %1435 }
 0x3ce   : > { %3378 = vmatmul.mubr.msk.f32.gmra.mrb[20].mxu1 %vm715_vm2, %v1434_v40 }
 0x3cf   : > { %3380 = vmatprep.mubr.msk.f32.mxu1 %vm715_vm2, %v1436_v41 }
 0x3d1   : > { %v1438_v42 = vpop.permute.xlu1 %1437  ;;  %v1440_v44 = vpop.permute.xlu0 %1439 }
 0x3d2   : > { %3381 = vmatmul.mubr.msk.f32.gmra.mrb[22].mxu1 %vm715_vm2, %v1438_v42 }
 0x3d3   : > { %3383 = vmatprep.mubr.msk.f32.mxu1 %vm715_vm2, %v1440_v44 }
 0x3d5   : > { %v1442_v46 = vpop.permute.xlu1 %1441  ;;  %v1444_v47 = vpop.permute.xlu0 %1443 }
 0x3d6   : > { %3384 = vmatmul.mubr.msk.f32.gmra.mrb[24].mxu1 %vm715_vm2, %v1442_v46 }
 0x3d7   : > { %3386 = vmatprep.mubr.msk.f32.mxu1 %vm715_vm2, %v1444_v47 }
 0x3d9   : > { %v1446_v48 = vpop.permute.xlu1 %1445  ;;  %v1448_v39 = vpop.permute.xlu0 %1447 }
 0x3da   : > { %3387 = vmatmul.mubr.msk.f32.gmra.mrb[26].mxu1 %vm715_vm2, %v1446_v48 }
 0x3db   : > { %3389 = vmatprep.mubr.msk.f32.mxu1 %vm715_vm2, %v1448_v39 }
 0x3dd   : > { %v1450_v45 = vpop.permute.xlu1 %1449  ;;  %v1452_v50 = vpop.permute.xlu0 %1451 }
 0x3de   : > { %3390 = vmatmul.mubr.msk.f32.gmra.mrb[28].mxu1 %vm715_vm2, %v1450_v45 }
 0x3df   : > { %3392 = vmatprep.mubr.msk.f32.mxu1 %vm715_vm2, %v1452_v50 }
 0x3e1   : > { %v1454_v37 = vpop.permute.xlu1 %1453  ;;  %v1456_v53 = vpop.permute.xlu0 %1455 }
 0x3e2   : > { %3393 = vmatmul.mubr.msk.f32.gmra.mrb[30].mxu1 %vm715_vm2, %v1454_v37 }
 0x3e3   : > { %3395 = vmatprep.mubr.msk.f32.mxu1 %vm715_vm2, %v1456_v53 }
 0x3e5   : > { %v1458_v54 = vpop.permute.xlu1 %1457 }
 0x3e6   : > { %3396 = vmatmul.mubr.msk.f32.gmra.mrb[32].mxu1 %vm715_vm2, %v1458_v54 }
 0x3e7   : > { %2573 = vmatprep.mubr.f32.mxu1 %v3718_v56 }
 0x49d   : > { %v3376_v52 = vpop.f32.mrb[18].mxu1 }
 0x49e   : > { %v1563_v61 = vadd.f32 %v3376_v52, %v4211_v58  ;;  %v1557_v62 = vpop.f32.mrb[19].mxu1 }
 0x49f   : > { %v1558_v49 = vadd.f32 %v4211_v58, %v1557_v62 }
 0x4a0   : > { %v1637_v31 = vmax.f32 %v1563_v61, 0.0 }
 0x4a1   : > { %v1636_v60 = vmax.f32 %v1558_v49, 0.0  ;;  %v3379_v4 = vpop.f32.mrb[20].mxu1 }
 0x4a2   : > { %v1573_v5 = vadd.f32 %v3379_v4, %v4211_v58  ;;  %v1567_v57 = vpop.f32.mrb[21].mxu1  ;;  %v1658_v6 = vmul.f32 %v4218_v0, %v1637_v31 }
 0x4a3   : > { %v1568_v51 = vadd.f32 %v4211_v58, %v1567_v57  ;;  %v1657_v2 = vmul.f32 %v4218_v0, %v1636_v60 }
 0x4a4   : > { %v1639_v8 = vmax.f32 %v1573_v5, 0.0  ;;  %v1676_v9 = vsel %vm715_vm2, %v1658_v6, 0.0 }
 0x4a5   : > { %v1638_v1 = vmax.f32 %v1568_v51, 0.0  ;;  %1677 = vadd.xlane.f32.xlu1 %v1676_v9  ;;  %v3382_v10 = vpop.f32.mrb[22].mxu1  ;;  %v1673_v12 = vsel %vm715_vm2, %v1657_v2, 0.0 }
 0x4a6   : > { %v1583_v3 = vadd.f32 %v3382_v10, %v4211_v58  ;;  %1674 = vadd.xlane.f32.xlu0 %v1673_v12  ;;  %v1577_v14 = vpop.f32.mrb[23].mxu1  ;;  %v1660_v15 = vmul.f32 %v4218_v0, %v1639_v8 }
 0x4a7   : > { %v1578_v7 = vadd.f32 %v4211_v58, %v1577_v14  ;;  %v1659_v35 = vmul.f32 %v4218_v0, %v1638_v1 }
 0x4a8   : > { %v1682_v16 = vsel %vm715_vm2, %v1660_v15, 0.0  ;;  %v1641_v18 = vmax.f32 %v1583_v3, 0.0 }
 0x4a9   : > { %v1640_v13 = vmax.f32 %v1578_v7, 0.0  ;;  %v3385_v20 = vpop.f32.mrb[24].mxu1  ;;  %v1679_v47 = vsel %vm715_vm2, %v1659_v35, 0.0 }
 0x4aa   : > { %v1593_v36 = vadd.f32 %v3385_v20, %v4211_v58  ;;  %1683 = vadd.xlane.f32.xlu0 %v1682_v16  ;;  %v1587_v38 = vpop.f32.mrb[25].mxu1  ;;  %v1662_v39 = vmul.f32 %v4218_v0, %v1641_v18 }
 0x4ab   : > { %v1588_v40 = vadd.f32 %v4211_v58, %v1587_v38  ;;  %v1661_v41 = vmul.f32 %v4218_v0, %v1640_v13 }
 0x4ac   : > { %v1643_v42 = vmax.f32 %v1593_v36, 0.0  ;;  %v1688_v62 = vsel %vm715_vm2, %v1662_v39, 0.0 }
 0x4ad   : > { %v1642_v44 = vmax.f32 %v1588_v40, 0.0  ;;  %v3388_v46 = vpop.f32.mrb[26].mxu1  ;;  %v1685_v48 = vsel %vm715_vm2, %v1661_v41, 0.0 }
 0x4ae   : > { %v1603_v45 = vadd.f32 %v3388_v46, %v4211_v58  ;;  %1680 = vadd.xlane.f32.xlu0 %v1679_v47  ;;  %1686 = vadd.xlane.f32.xlu1 %v1685_v48  ;;  %v1597_v50 = vpop.f32.mrb[27].mxu1  ;;  %v1664_v37 = vmul.f32 %v4218_v0, %v1643_v42 }
 0x4af   : > { %v1598_v53 = vadd.f32 %v4211_v58, %v1597_v50  ;;  %v1663_v49 = vmul.f32 %v4218_v0, %v1642_v44  ;;  %v4266_v50 = vstv %s3558_s12 }
 0x4b0   : > { %v1645_v54 = vmax.f32 %v1603_v45, 0.0  ;;  %v1694_v43 = vsel %vm715_vm2, %v1664_v37, 0.0 }
 0x4b1   : > { %v1644_v52 = vmax.f32 %v1598_v53, 0.0  ;;  %v3391_v61 = vpop.f32.mrb[28].mxu1  ;;  %v1691_v8 = vsel %vm715_vm2, %v1663_v49, 0.0 }
 0x4b2   : > { %v1613_v31 = vadd.f32 %v3391_v61, %v4211_v58  ;;  %1689 = vadd.xlane.f32.xlu0 %v1688_v62  ;;  %1695 = vadd.xlane.f32.xlu1 %v1694_v43  ;;  %v1607_v60 = vpop.f32.mrb[29].mxu1  ;;  %v1666_v4 = vmul.f32 %v4218_v0, %v1645_v54 }
 0x4b3   : > { %v1608_v5 = vadd.f32 %v4211_v58, %v1607_v60  ;;  %v1665_v9 = vmul.f32 %v4218_v0, %v1644_v52 }
 0x4b4   : > { %v1647_v57 = vmax.f32 %v1613_v31, 0.0  ;;  %v1700_v6 = vsel %vm715_vm2, %v1666_v4, 0.0 }
 0x4b5   : > { %v1646_v51 = vmax.f32 %v1608_v5, 0.0  ;;  %v3394_v2 = vpop.f32.mrb[30].mxu1  ;;  %v1697_v13 = vsel %vm715_vm2, %v1665_v9, 0.0 }
 0x4b6   : > { %v1623_v1 = vadd.f32 %v3394_v2, %v4211_v58  ;;  %1692 = vadd.xlane.f32.xlu1 %v1691_v8  ;;  %1701 = vadd.xlane.f32.xlu0 %v1700_v6  ;;  %v1617_v10 = vpop.f32.mrb[31].mxu1  ;;  %v1668_v12 = vmul.f32 %v4218_v0, %v1647_v57  ;;  %v4274_v8 = vand.u32 127, %v1164_v22 }
 0x4b7   : > { %v1618_v3 = vadd.f32 %v4211_v58, %v1617_v10  ;;  %v1667_v15 = vmul.f32 %v4218_v0, %v1646_v51 }
 0x4b8   : > { %v1706_v14 = vsel %vm715_vm2, %v1668_v12, 0.0  ;;  %v1649_v7 = vmax.f32 %v1623_v1, 0.0 }
 0x4b9   : > { %v1648_v16 = vmax.f32 %v1618_v3, 0.0  ;;  %v3397_v18 = vpop.f32.mrb[32].mxu1  ;;  %v1703_v40 = vsel %vm715_vm2, %v1667_v15, 0.0 }
 0x4ba   : > { %v1633_v20 = vadd.f32 %v3397_v18, %v4211_v58  ;;  %1698 = vadd.xlane.f32.xlu1 %v1697_v13  ;;  %1707 = vadd.xlane.f32.xlu0 %v1706_v14  ;;  %v1627_v35 = vpop.f32.mrb[33].mxu1  ;;  %v1670_v46 = vmul.f32 %v4218_v0, %v1649_v7 }
 0x4bb   : > { %v1628_v36 = vadd.f32 %v4211_v58, %v1627_v35  ;;  %v1669_v38 = vmul.f32 %v4218_v0, %v1648_v16  ;;  %v4280_v16 = vsub.s32 %v4274_v8, %v4074_v24 }
 0x4bc   : > { %v1651_v41 = vmax.f32 %v1633_v20, 0.0  ;;  %v1712_v48 = vsel %vm715_vm2, %v1670_v46, 0.0 }
 0x4bd   : > { %v1650_v42 = vmax.f32 %v1628_v36, 0.0  ;;  %v1709_v44 = vsel %vm715_vm2, %v1669_v38, 0.0 }
 0x4be   : > { %1704 = vadd.xlane.f32.xlu0 %v1703_v40  ;;  %1710 = vadd.xlane.f32.xlu1 %v1709_v44  ;;  %v1672_v58 = vmul.f32 %v4218_v0, %v1651_v41 }
 0x4bf   : > { %v1671_v47 = vmul.f32 %v4218_v0, %v1650_v42 }
 0x4c0   : > { %v1718_v45 = vsel %vm715_vm2, %v1672_v58, 0.0 }
 0x4c1   : > { %v1715_v39 = vsel %vm715_vm2, %v1671_v47, 0.0 }
 0x4c2   : > { %1713 = vadd.xlane.f32.xlu0 %v1712_v48  ;;  %1716 = vadd.xlane.f32.xlu1 %v1715_v39 }
 0x4c6   : > { %1719 = vadd.xlane.f32.xlu0 %v1718_v45 }
 0x532   : > { %v1678_v37 = vpop.xlane.xlu1 %1677 }
 0x533   : > { %v1727_v53 = vadd.f32 %v4266_v50, %v1678_v37  ;;  %v1675_v54 = vpop.xlane.xlu0 %1674 }
 0x534   : > { %v1726_v43 = vadd.f32 %v4266_v50, %v1675_v54 }
 0x535   : > { %v1744_v52 = vmul.f32 1.442695, %v1727_v53  ;;  %vm1775_vm10 = vcmp.ne.f32.partialorder %v1727_v53, 0.0 }
 0x536   : > { %v1742_v61 = vmul.f32 1.442695, %v1726_v43  ;;  %vm1774_vm11 = vcmp.ne.f32.partialorder %v1726_v43, 0.0  ;;  %v3081_v22 = vsel %vm1775_vm10, 1.0, %v3718_v56 }
 0x537   : > { %v1684_v62 = vpop.xlane.xlu0 %1683  ;;  %3607 = vpow2.f32 %v1744_v52  ;;  %v3080_v13 = vsel %vm1774_vm11, 1.0, %v3718_v56 }
 0x538   : > { %v1729_v49 = vadd.f32 %v4266_v50, %v1684_v62  ;;  %3609 = vpow2.f32 %v1742_v61 }
 0x53a   : > { %v1748_v0 = vmul.f32 1.442695, %v1729_v49  ;;  %vm1777_vm12 = vcmp.ne.f32.partialorder %v1729_v49, 0.0 }
 0x53b   : > { %v1687_v31 = vpop.xlane.xlu1 %1686  ;;  %v1681_v60 = vpop.xlane.xlu0 %1680  ;;  %v3083_v48 = vsel %vm1777_vm12, 1.0, %v3718_v56  ;;  %vm1936_vm12 = vcmask 64512  }
 0x53c   : > { %v1730_v4 = vadd.f32 %v4266_v50, %v1687_v31  ;;  %v1728_v5 = vadd.f32 %v4266_v50, %v1681_v60  ;;  %3611 = vpow2.f32 %v1748_v0 }
 0x53e   : > { %v1750_v57 = vmul.f32 1.442695, %v1730_v4  ;;  %v1746_v6 = vmul.f32 1.442695, %v1728_v5  ;;  %vm1778_vm13 = vcmp.ne.f32.partialorder %v1730_v4, 0.0  ;;  %vm1776_vm14 = vcmp.ne.f32.partialorder %v1728_v5, 0.0 }
 0x53f   : > { %v1696_v51 = vpop.xlane.xlu1 %1695  ;;  %v1690_v2 = vpop.xlane.xlu0 %1689  ;;  %v3084_v39 = vsel %vm1778_vm13, 1.0, %v3718_v56  ;;  %v3082_v58 = vsel %vm1776_vm14, 1.0, %v3718_v56 }
 0x540   : > { %3613 = vpow2.f32 %v1750_v57  ;;  %v1733_v9 = vadd.f32 %v4266_v50, %v1696_v51  ;;  %v1731_v1 = vadd.f32 %v4266_v50, %v1690_v2 }
 0x541   : > { %3615 = vpow2.f32 %v1746_v6  ;;  %v3608_v3 = vpop.eup %3607 }
 0x542   : > { %v1756_v10 = vmul.f32 1.442695, %v1733_v9  ;;  %v1752_v12 = vmul.f32 1.442695, %v1731_v1  ;;  %v3610_v7 = vpop.eup %3609  ;;  %v4288_v35 = vmul.f32 %v3608_v3, %v3081_v22  ;;  %vm1781_vm15 = vcmp.ne.f32.partialorder %v1733_v9, 0.0 }
 0x543   : > { %v1693_v14 = vpop.xlane.xlu1 %1692  ;;  %v1702_v15 = vpop.xlane.xlu0 %1701  ;;  %v4290_v38 = vmul.f32 %v3610_v7, %v3080_v13  ;;  %vm1779_vm1 = vcmp.ne.f32.partialorder %v1731_v1, 0.0 }
 0x544   : > { %3617 = vpow2.f32 %v1756_v10  ;;  %v1732_v18 = vadd.f32 %v4266_v50, %v1693_v14  ;;  %v4286_v20 = vadd.f32 %v4266_v50, %v1702_v15  ;;  %v1863_v37 = vrot.slane %v4288_v35, %v4280_v16 }
 0x545   : > { %3619 = vpow2.f32 %v1752_v12  ;;  %v1859_v52 = vrot.slane %v4290_v38, %v4280_v16  ;;  %v3087_v12 = vsel %vm1781_vm15, 1.0, %v3718_v56  ;;  %v3085_v3 = vsel %vm1779_vm1, 1.0, %v3718_v56 }
 0x546   : > { %v1754_v36 = vmul.f32 1.442695, %v1732_v18  ;;  %v1760_v40 = vmul.f32 1.442695, %v4286_v20  ;;  %v3612_v44 = vpop.eup %3611  ;;  %vm1780_vm2 = vcmp.ne.f32.partialorder %v1732_v18, 0.0  ;;  %vm1783_vm10 = vcmp.ne.f32.partialorder %v4286_v20, 0.0 }
 0x547   : > { %v1699_v41 = vpop.xlane.xlu1 %1698  ;;  %v1708_v42 = vpop.xlane.xlu0 %1707  ;;  %v4305_v61 = vmul.f32 %v3612_v44, %v3083_v48  ;;  %v1920_v10 = vsel %vm1058_vm3, %v1863_v37, %v1859_v52  ;;  %v3086_v14 = vsel %vm1780_vm2, 1.0, %v3718_v56  ;;  %v3089_v52 = vsel %vm1783_vm10, 1.0, %v3718_v56 }
 0x548   : > { %3621 = vpow2.f32 %v1754_v36  ;;  %v1734_v46 = vadd.f32 %v4266_v50, %v1699_v41  ;;  %v4295_v47 = vadd.f32 %v4266_v50, %v1708_v42 }
 0x549   : > { %3623 = vpow2.f32 %v1760_v40  ;;  %v1871_v22 = vrot.slane %v4305_v61, %v4280_v16 }
 0x54a   : > { %v3614_v45 = vpop.eup %3613  ;;  %v1758_v53 = vmul.f32 1.442695, %v1734_v46  ;;  %v1764_v54 = vmul.f32 1.442695, %v4295_v47  ;;  %vm1782_vm11 = vcmp.ne.f32.partialorder %v1734_v46, 0.0  ;;  %vm1785_vm13 = vcmp.ne.f32.partialorder %v4295_v47, 0.0 }
 0x54b   : > { %v3616_v43 = vpop.eup %3615  ;;  %v1711_v62 = vpop.xlane.xlu1 %1710  ;;  %v4311_v4 = vmul.f32 %v3614_v45, %v3084_v39 }
 0x54c   : > { %v1705_v49 = vpop.xlane.xlu0 %1704  ;;  %v4307_v0 = vmul.f32 %v3616_v43, %v3082_v58  ;;  %3625 = vpow2.f32 %v1758_v53  ;;  %v1738_v31 = vadd.f32 %v4266_v50, %v1711_v62  ;;  %v3088_v62 = vsel %vm1782_vm11, 1.0, %v3718_v56 }
 0x54d   : > { %v1736_v60 = vadd.f32 %v4266_v50, %v1705_v49  ;;  %3627 = vpow2.f32 %v1764_v54  ;;  %v1875_v18 = vrot.slane %v4311_v4, %v4280_v16 }
 0x54e   : > { %v3618_v5 = vpop.eup %3617  ;;  %v1867_v57 = vrot.slane %v4307_v0, %v4280_v16  ;;  %v1766_v6 = vmul.f32 1.442695, %v1738_v31  ;;  %vm1786_vm14 = vcmp.ne.f32.partialorder %v1738_v31, 0.0 }
 0x54f   : > { %v1762_v51 = vmul.f32 1.442695, %v1736_v60  ;;  %v3620_v2 = vpop.eup %3619  ;;  %v1717_v15 = vpop.xlane.xlu1 %1716  ;;  %v4332_v41 = vmul.f32 %v3618_v5, %v3087_v12  ;;  %vm1784_vm15 = vcmp.ne.f32.partialorder %v1736_v60, 0.0  ;;  %v3091_v12 = vsel %vm1785_vm13, 1.0, %v3718_v56 }
 0x550   : > { %v1714_v7 = vpop.xlane.xlu0 %1713  ;;  %v1921_v13 = vsel %vm1060_vm4, %v1867_v57, %v1920_v10  ;;  %v4325_v36 = vmul.f32 %v3620_v2, %v3085_v3  ;;  %3629 = vpow2.f32 %v1766_v6  ;;  %v1740_v9 = vadd.f32 %v4266_v50, %v1717_v15 }
 0x551   : > { %3631 = vpow2.f32 %v1762_v51  ;;  %v1739_v1 = vadd.f32 %v4266_v50, %v1714_v7  ;;  %v1922_v42 = vsel %vm1062_vm5, %v1871_v22, %v1921_v13  ;;  %v3092_v31 = vsel %vm1786_vm14, 1.0, %v3718_v56 }
 0x552   : > { %v3622_v40 = vpop.eup %3621  ;;  %v1879_v44 = vrot.slane %v4325_v36, %v4280_v16  ;;  %v1770_v39 = vmul.f32 1.442695, %v1740_v9  ;;  %v1923_v43 = vsel %vm1064_vm6, %v1875_v18, %v1922_v42  ;;  %v3090_v60 = vsel %vm1784_vm15, 1.0, %v3718_v56 }
 0x553   : > { %v4337_v48 = vmul.f32 %v3622_v40, %v3086_v14  ;;  %v1768_v58 = vmul.f32 1.442695, %v1739_v1  ;;  %v3624_v53 = vpop.eup %3623  ;;  %vm1788_vm1 = vcmp.ne.f32.partialorder %v1740_v9, 0.0  ;;  %vm1787_vm2 = vcmp.ne.f32.partialorder %v1739_v1, 0.0 }
 0x554   : > { %v1720_v45 = vpop.xlane.xlu0 %1719  ;;  %3633 = vpow2.f32 %v1770_v39  ;;  %v1924_v57 = vsel %vm1066_vm7, %v1879_v44, %v1923_v43  ;;  %v4354_v51 = vmul.f32 %v3624_v53, %v3089_v52  ;;  %v3094_v39 = vsel %vm1788_vm1, 1.0, %v3718_v56 }
 0x555   : > { %v1741_v37 = vadd.f32 %v4266_v50, %v1720_v45  ;;  %v1883_v54 = vrot.slane %v4337_v48, %v4280_v16  ;;  %3635 = vpow2.f32 %v1768_v58  ;;  %v1887_v50 = vrot.slane %v4332_v41, %v4280_v16 }
 0x556   : > { %v3626_v46 = vpop.eup %3625  ;;  %v1895_v13 = vrot.slane %v4354_v51, %v4280_v16  ;;  %v3093_v1 = vsel %vm1787_vm2, 1.0, %v3718_v56 }
 0x557   : > { %v1772_v49 = vmul.f32 1.442695, %v1741_v37  ;;  %v4347_v5 = vmul.f32 %v3626_v46, %v3088_v62  ;;  %v3628_v6 = vpop.eup %3627  ;;  %v1925_v20 = vsel %vm1068_vm8, %v1883_v54, %v1924_v57  ;;  %vm1789_vm10 = vcmp.ne.f32.partialorder %v1741_v37, 0.0 }
 0x558   : > { %v1926_v2 = vsel %vm1070_vm9, %v1887_v50, %v1925_v20  ;;  %v4361_v15 = vmul.f32 %v3628_v6, %v3091_v12  ;;  %v3095_v62 = vsel %vm1789_vm10, 1.0, %v3718_v56  ;;  %v3719_v12 = vmov 0  }
 0x559   : > { %3637 = vpow2.f32 %v1772_v49  ;;  %v1937_v47 = vsel %vm1936_vm12, %v1926_v2, 0.0  ;;  %v1891_v14 = vrot.slane %v4347_v5, %v4280_v16  ;;  %3606 = vset.pattern.permute.xlu0 %v3719_v12  ;;  %3605 = vset.pattern.permute.xlu1 %v3719_v12 }
 0x55a   : > { %v3630_v10 = vpop.eup %3629  ;;  %1938 = vadd.xlane.f32.xlu1 %v1937_v47  ;;  %v1903_v44 = vrot.slane %v4361_v15, %v4280_v16 }
 0x55b   : > { %v3632_v3 = vpop.eup %3631  ;;  %v4365_v7 = vmul.f32 %v3630_v10, %v3092_v31  ;;  %v1927_v42 = vsel %vm1058_vm3, %v1895_v13, %v1891_v14  ;;  %v1957_v14 = vsub.s32 2, %v4074_v24 }
 0x55c   : > { %v4367_v22 = vmul.f32 %v3632_v3, %v3090_v60  ;;  %v4398_v3 = vsub.s32 1, %v4074_v24 }
 0x55d   : > { %v1907_v9 = vrot.slane %v4365_v7, %v4280_v16 }
 0x55e   : > { %v1899_v40 = vrot.slane %v4367_v22, %v4280_v16  ;;  %v3634_v18 = vpop.eup %3633 }
 0x55f   : > { %v3636_v58 = vpop.eup %3635  ;;  %v1836_v53 = vmul.f32 %v3634_v18, %v3094_v39 }
 0x560   : > { %v1928_v45 = vsel %vm1060_vm4, %v1899_v40, %v1927_v42  ;;  %v4381_v54 = vmul.f32 %v3636_v58, %v3093_v1  ;;  %v1961_v40 = vsub.s32 3, %v4074_v24 }
 0x561   : > { %v1929_v43 = vsel %vm1062_vm5, %v1903_v44, %v1928_v45  ;;  %v1915_v52 = vrot.slane %v1836_v53, %v4280_v16 }
 0x562   : > { %v1930_v37 = vsel %vm1064_vm6, %v1907_v9, %v1929_v43  ;;  %v1911_v49 = vrot.slane %v4381_v54, %v4280_v16  ;;  %v1965_v43 = vsub.s32 4, %v4074_v24 }
 0x563   : > { %v3638_v46 = vpop.eup %3637 }
 0x564   : > { %v4389_v50 = vmul.f32 %v3638_v46, %v3095_v62  ;;  %v1931_v6 = vsel %vm1066_vm7, %v1911_v49, %v1930_v37 }
 0x565   : > { %v1932_v20 = vsel %vm1068_vm8, %v1915_v52, %v1931_v6 }
 0x566   : > { %v1919_v57 = vrot.slane %v4389_v50, %v4280_v16  ;;  %v1977_v16 = vsub.s32 7, %v4074_v24 }
 0x568   : > { %v1933_v2 = vsel %vm1070_vm9, %v1919_v57, %v1932_v20 }
 0x569   : > { %v1940_v10 = vsel %vm1936_vm12, %v1933_v2, 0.0 }
 0x56a   : > { %1941 = vadd.xlane.f32.xlu0 %v1940_v10 }
 0x5e7   : > { %v1939_v47 = vpop.xlane.xlu1 %1938 }
 0x5e8   : > { %3639 = vrcp.f32 %v1939_v47 }
 0x5f2   : > { %v3640_v31 = vpop.eup %3639 }
 0x5f3   : > { %v1950_v60 = vrot.slane %v3640_v31, %v4078_v29  ;;  %v1954_v13 = vrot.slane %v3640_v31, %v4398_v3  ;;  %v1958_v39 = vrot.slane %v3640_v31, %v1957_v14  ;;  %v1978_v58 = vrot.slane %v3640_v31, %v1977_v16 }
 0x5f4   : > { %v1962_v1 = vrot.slane %v3640_v31, %v1961_v40  ;;  %v1966_v52 = vrot.slane %v3640_v31, %v1965_v43 }
 0x5f5   : > { %v2027_v42 = vmul.f32 %v1950_v60, %v4290_v38  ;;  %v2028_v44 = vmul.f32 %v1954_v13, %v4288_v35  ;;  %v2029_v9 = vmul.f32 %v1958_v39, %v4307_v0  ;;  %v2034_v45 = vmul.f32 %v1978_v58, %v4332_v41 }
 0x5f6   : > { %v2030_v46 = vmul.f32 %v1962_v1, %v4305_v61  ;;  %v1969_v38 = vsub.s32 5, %v4074_v24  ;;  %v2031_v62 = vmul.f32 %v1966_v52, %v4311_v4  ;;  %v1973_v0 = vsub.s32 6, %v4074_v24 }
 0x5f7   : > { %v1942_v18 = vpop.xlane.xlu0 %1941  ;;  %2263 = vperm.xlu1 %3605, %v2027_v42   ;;  %2268 = vperm.xlu0 %3606, %v2028_v44   ;;  %v2691_v42 = vld [vmem:[%s4700_s4 + $0x8] sm:$0xff]  ;;  %v2692_v44 = vld [vmem:[%s4700_s4 + $0x10] sm:$0xff] }
 0x5f8   : > { %3641 = vrcp.f32 %v1942_v18  ;;  %v1970_v49 = vrot.slane %v3640_v31, %v1969_v38  ;;  %v1974_v20 = vrot.slane %v3640_v31, %v1973_v0 }
 0x5fa   : > { %v2032_v6 = vmul.f32 %v1970_v49, %v4325_v36  ;;  %v2033_v2 = vmul.f32 %v1974_v20, %v4337_v48  ;;  %v2472_v48 = vld [vmem:[%s4699_s3 + $0x18] sm:$0xff] }
 0x5fb   : > { %2273 = vperm.xlu1 %3605, %v2029_v9   ;;  %2298 = vperm.xlu0 %3606, %v2034_v45   ;;  %v2694_v9 = vld [vmem:[%s4700_s4 + $0x20] sm:$0xff]  ;;  %v2695_v45 = vld [vmem:[%s4700_s4 + $0x28] sm:$0xff]  ;;  %v2701_v49 = vld [vmem:[%s4700_s4 + $0x58] sm:$0xff] }
 0x5fc   : > { %v3529_v1 = vpack.c.bf16 %v2695_v45, %v2694_v9 }
 0x5ff   : > { %2278 = vperm.xlu1 %3605, %v2030_v46   ;;  %v2697_v46 = vld [vmem:[%s4700_s4 + $0x38] sm:$0xff] }
 0x602   : > { %v3642_v35 = vpop.eup %3641 }
 0x603   : > { %v1998_v37 = vrot.slane %v3642_v35, %v1965_v43  ;;  %2283 = vperm.xlu1 %3605, %v2031_v62   ;;  %v2006_v57 = vrot.slane %v3642_v35, %v1973_v0  ;;  %v1982_v10 = vrot.slane %v3642_v35, %v4078_v29  ;;  %v1986_v12 = vrot.slane %v3642_v35, %v4398_v3  ;;  %v2696_v43 = vld [vmem:[%s4700_s4 + $0x30] sm:$0xff] }
 0x604   : > { %v1990_v47 = vrot.slane %v3642_v35, %v1957_v14  ;;  %v1994_v31 = vrot.slane %v3642_v35, %v1961_v40  ;;  %v2002_v60 = vrot.slane %v3642_v35, %v1969_v38  ;;  %v2010_v14 = vrot.slane %v3642_v35, %v1977_v16  ;;  %v2690_v16 = vld [vmem:[%s4700_s4] sm:$0xff]  ;;  %v2699_v35 = vld [vmem:[%s4700_s4 + $0x48] sm:$0xff] }
 0x605   : > { %v2039_v41 = vmul.f32 %v1998_v37, %v4365_v7  ;;  %v2041_v61 = vmul.f32 %v2006_v57, %v1836_v53  ;;  %v2035_v4 = vmul.f32 %v1982_v10, %v4347_v5  ;;  %v2036_v7 = vmul.f32 %v1986_v12, %v4354_v51  ;;  %v2474_v5 = vld [vmem:[%s4699_s3 + $0x28] sm:$0xff]  ;;  %v2698_v38 = vld [vmem:[%s4700_s4 + $0x40] sm:$0xff]  ;;  %v2700_v37 = vld [vmem:[%s4700_s4 + $0x50] sm:$0xff] }
 0x606   : > { %v2037_v36 = vmul.f32 %v1990_v47, %v4367_v22  ;;  %v2038_v53 = vmul.f32 %v1994_v31, %v4361_v15  ;;  %v3517_v13 = vpack.c.bf16 %v2474_v5, %v2472_v48  ;;  %v2040_v51 = vmul.f32 %v2002_v60, %v4381_v54  ;;  %v2471_v22 = vld [vmem:[%s4699_s3 + $0x10] sm:$0xff]  ;;  %v2473_v15 = vld [vmem:[%s4699_s3 + $0x20] sm:$0xff]  ;;  %v2470_v54 = vld [vmem:[%s4699_s3 + $0x8] sm:$0xff] }
 0x607   : > { %2323 = vperm.xlu0 %3606, %v2039_v41   ;;  %2288 = vperm.xlu1 %3605, %v2032_v6   ;;  %v3519_v40 = vpack.c.bf16 %v2473_v15, %v2471_v22  ;;  %v2042_v18 = vmul.f32 %v2010_v14, %v4389_v50  ;;  %v2693_v50 = vld [vmem:[%s4700_s4 + $0x18] sm:$0xff]  ;;  %v3521_v39 = vpack.c.bf16 %v2691_v42, %v2690_v16  ;;  %v2827_v41 = vadd.s32 4294967295, %v4274_v8  ;;  %v4480_v57 = vld [vmem:[%s4698_s2 + $0xa8] ss:$0 sm:$0xff] }
 0x608   : > { %3518 = vmatprep.subr.bf16.mxu1 %v3517_v13  ;;  %v3525_v58 = vpack.c.bf16 %v2693_v50, %v2692_v44  ;;  %v3533_v52 = vpack.c.bf16 %v2697_v46, %v2696_v43  ;;  %v3537_v62 = vpack.c.bf16 %v2699_v35, %v2698_v38  ;;  %v3541_v0 = vpack.c.bf16 %v2701_v49, %v2700_v37 }
 0x609   : > { %3520 = vmatpush1.bf16.msra.mxu1 %v3519_v40  ;;  %3522 = vmatprep.subr.bf16.mxu0 %v3521_v39  ;;  %v4483_v6 = vsub.s32 %v2827_v41, %v4074_v24  ;;  %v2188_v20 = vadd.f32 %v4156_v11, %v4480_v57  ;;  %v2193_v47 = vadd.f32 %v4480_v57, %v4162_v59 }
 0x60a   : > { %2592 = vmatprep.subr.mxu1 %v2470_v54  ;;  %3524 = vmatpush3.bf16.msra.mxu0 %v3521_v39  ;;  %v2198_v14 = vadd.f32 %v4160_v19, %v4480_v57  ;;  %v2218_v59 = vadd.f32 %v4168_v17, %v4480_v57  ;;  %v2203_v19 = vadd.f32 %v4480_v57, %v4166_v23 }
 0x60b   : > { %2333 = vperm.xlu0 %3606, %v2041_v61   ;;  %2293 = vperm.xlu1 %3605, %v2033_v2   ;;  %v2183_v61 = vadd.f32 %v4480_v57, %v4158_v55  ;;  %v2208_v23 = vadd.f32 %v4164_v21, %v4480_v57  ;;  %v2243_v21 = vadd.f32 %v4480_v57, %v4182_v32 }
 0x60c   : > { %3526 = vmatprep.subr.bf16.mxu0 %v3525_v58 }
 0x60e   : > { %3528 = vmatpush3.bf16.msra.mxu0 %v3525_v58 }
 0x60f   : > { %2303 = vperm.xlu1 %3605, %v2035_v4   ;;  %3530 = vmatprep.subr.bf16.mxu0 %v3529_v1 }
 0x612   : > { %3532 = vmatpush3.bf16.msra.mxu0 %v3529_v1 }
 0x613   : > { %2308 = vperm.xlu1 %3605, %v2036_v7   ;;  %3534 = vmatprep.subr.bf16.mxu0 %v3533_v52 }
 0x616   : > { %3536 = vmatpush3.bf16.msra.mxu0 %v3533_v52 }
 0x617   : > { %2313 = vperm.xlu1 %3605, %v2037_v36   ;;  %3538 = vmatprep.subr.bf16.mxu0 %v3537_v62 }
 0x61a   : > { %3540 = vmatpush3.bf16.msra.mxu0 %v3537_v62 }
 0x61b   : > { %2318 = vperm.xlu1 %3605, %v2038_v53   ;;  %3542 = vmatprep.subr.bf16.mxu0 %v3541_v0 }
 0x61e   : > { %3544 = vmatpush3.bf16.msra.mxu0 %v3541_v0 }
 0x61f   : > { %2328 = vperm.xlu1 %3605, %v2040_v51  }
 0x623   : > { %2338 = vperm.xlu1 %3605, %v2042_v18  }
 0x676   : > { %v2264_v2 = vpop.permute.xlu1 %2263  ;;  %v2269_v10 = vpop.permute.xlu0 %2268 }
 0x677   : > { %v2341_v4 = vmul.f32 %v2264_v2, %v2183_v61  ;;  %v2831_v12 = vrot.slane %v2264_v2, %v4483_v6  ;;  %v2342_v8 = vmul.f32 %v2269_v10, %v2188_v20  ;;  %v2835_v7 = vrot.slane %v2269_v10, %v4483_v6 }
 0x679   : > { %v2357_v24 = vsel %vm273_vm0, %v2341_v4, 0.0  ;;  %v2364_v36 = vsel %vm273_vm0, %v2342_v8, 0.0  ;;  %v2892_v11 = vsel %vm1058_vm3, %v2835_v7, %v2831_v12 }
 0x67a   : > { %v2358_v31 = vrot.slane %v2357_v24, 4  ;;  %v2365_v53 = vrot.slane %v2364_v36, 4  ;;  %v2274_v55 = vpop.permute.xlu1 %2273  ;;  %v4497_v51 = vpop.permute.xlu0 %2298 }
 0x67b   : > { %v2343_v60 = vmul.f32 %v2274_v55, %v2193_v47  ;;  %v2839_v48 = vrot.slane %v2274_v55, %v4483_v6  ;;  %v2348_v42 = vmul.f32 %v4497_v51, %v2218_v59 }
 0x67c   : > { %v2359_v5 = vadd.f32 %v2358_v31, %v2357_v24  ;;  %v2366_v13 = vadd.f32 %v2365_v53, %v2364_v36 }
 0x67d   : > { %v2371_v22 = vsel %vm273_vm0, %v2343_v60, 0.0  ;;  %v2893_v15 = vsel %vm1060_vm4, %v2839_v48, %v2892_v11  ;;  %v2406_v38 = vsel %vm273_vm0, %v2348_v42, 0.0 }
 0x67e   : > { %v2360_v40 = vrot.slane %v2359_v5, 2  ;;  %v2367_v18 = vrot.slane %v2366_v13, 2  ;;  %v2372_v54 = vrot.slane %v2371_v22, 4  ;;  %v2279_v16 = vpop.permute.xlu1 %2278  ;;  %v2407_v8 = vrot.slane %v2406_v38, 4 }
 0x67f   : > { %v2344_v44 = vmul.f32 %v2279_v16, %v2198_v14  ;;  %v2843_v50 = vrot.slane %v2279_v16, %v4483_v6 }
 0x680   : > { %v2361_v39 = vadd.f32 %v2360_v40, %v2359_v5  ;;  %v2368_v58 = vadd.f32 %v2367_v18, %v2366_v13  ;;  %v2373_v9 = vadd.f32 %v2372_v54, %v2371_v22  ;;  %v2408_v13 = vadd.f32 %v2407_v8, %v2406_v38 }
 0x681   : > { %v2378_v17 = vsel %vm273_vm0, %v2344_v44, 0.0  ;;  %v2894_v45 = vsel %vm1062_vm5, %v2843_v50, %v2893_v15  ;;  %v2213_v15 = vadd.f32 %v4480_v57, %v4170_v63  ;;  %v2228_v40 = vadd.f32 %v4172_v25, %v4480_v57 }
 0x682   : > { %v2362_v1 = vrot.slane %v2361_v39, 1  ;;  %v2369_v43 = vrot.slane %v2368_v58, 1  ;;  %v2374_v46 = vrot.slane %v2373_v9, 2  ;;  %v2284_v52 = vpop.permute.xlu1 %2283  ;;  %v2379_v35 = vrot.slane %v2378_v17, 4 }
 0x683   : > { %v2345_v62 = vmul.f32 %v2284_v52, %v2203_v19  ;;  %v2847_v37 = vrot.slane %v2284_v52, %v4483_v6  ;;  %v2223_v54 = vadd.f32 %v4480_v57, %v4174_v26  ;;  %v2253_v50 = vadd.f32 %v4480_v57, %v4186_v34 }
 0x684   : > { %v2363_v49 = vadd.f32 %v2362_v1, %v2361_v39  ;;  %v2370_v0 = vadd.f32 %v2369_v43, %v2368_v58  ;;  %v2375_v41 = vadd.f32 %v2374_v46, %v2373_v9  ;;  %v2380_v61 = vadd.f32 %v2379_v35, %v2378_v17 }
 0x685   : > { %v2385_v2 = vsel %vm273_vm0, %v2345_v62, 0.0  ;;  %v2895_v10 = vsel %vm1064_vm6, %v2847_v37, %v2894_v45  ;;  %v2409_v25 = vrot.slane %v2408_v13, 2  ;;  %v2859_v19 = vrot.slane %v4497_v51, %v4483_v6 }
 0x686   : > { %v4513_v20 = vpop.permute.xlu0 %2323  ;;  %v2491_v4 = vsel %vm1058_vm3, %v2370_v0, %v2363_v49  ;;  %v2376_v12 = vrot.slane %v2375_v41, 1  ;;  %v2386_v7 = vrot.slane %v2385_v2, 4  ;;  %v2289_v47 = vpop.permute.xlu1 %2288  ;;  %v2381_v24 = vrot.slane %v2380_v61, 2 }
 0x687   : > { %v2879_v36 = vrot.slane %v4513_v20, %v4483_v6  ;;  %v2346_v11 = vmul.f32 %v2289_v47, %v2208_v23  ;;  %v2851_v48 = vrot.slane %v2289_v47, %v4483_v6  ;;  %v2353_v42 = vmul.f32 %v4513_v20, %v2243_v21 }
 0x688   : > { %v2377_v31 = vadd.f32 %v2376_v12, %v2375_v41  ;;  %v2387_v53 = vadd.f32 %v2386_v7, %v2385_v2  ;;  %v2382_v55 = vadd.f32 %v2381_v24, %v2380_v61  ;;  %v2410_v41 = vadd.f32 %v2409_v25, %v2408_v13 }
 0x689   : > { %v2392_v60 = vsel %vm273_vm0, %v2346_v11, 0.0  ;;  %v2896_v32 = vsel %vm1066_vm7, %v2851_v48, %v2895_v10  ;;  %v2441_v38 = vsel %vm273_vm0, %v2353_v42, 0.0  ;;  %v2233_v7 = vadd.f32 %v4480_v57, %v4178_v28 }
 0x68a   : > { %v2492_v5 = vsel %vm1060_vm4, %v2377_v31, %v2491_v4  ;;  %v2388_v14 = vrot.slane %v2387_v53, 2  ;;  %v2393_v59 = vrot.slane %v2392_v60, 4  ;;  %v2294_v22 = vpop.permute.xlu1 %2293  ;;  %v2383_v18 = vrot.slane %v2382_v55, 1  ;;  %v4537_v58 = vpop.permute.xlu0 %2333 }
 0x68b   : > { %v2347_v63 = vmul.f32 %v2294_v22, %v2213_v15  ;;  %v2855_v9 = vrot.slane %v2294_v22, %v4483_v6  ;;  %v2355_v62 = vmul.f32 %v4537_v58, %v2253_v50  ;;  %v2442_v47 = vrot.slane %v2441_v38, 4 }
 0x68c   : > { %v2389_v16 = vadd.f32 %v2388_v14, %v2387_v53  ;;  %v2394_v44 = vadd.f32 %v2393_v59, %v2392_v60  ;;  %v2384_v39 = vadd.f32 %v2383_v18, %v2382_v55  ;;  %v2238_v60 = vadd.f32 %v4176_v27, %v4480_v57 }
 0x68d   : > { %v2399_v43 = vsel %vm273_vm0, %v2347_v63, 0.0  ;;  %v2897_v46 = vsel %vm1068_vm8, %v2855_v9, %v2896_v32  ;;  %v2455_v11 = vsel %vm273_vm0, %v2355_v62, 0.0  ;;  %v2411_v48 = vrot.slane %v2410_v41, 1 }
 0x68e   : > { %v2390_v17 = vrot.slane %v2389_v16, 1  ;;  %v2395_v45 = vrot.slane %v2394_v44, 2  ;;  %v2304_v26 = vpop.permute.xlu1 %2303  ;;  %v2493_v1 = vsel %vm1062_vm5, %v2384_v39, %v2492_v5  ;;  %v2400_v37 = vrot.slane %v2399_v43, 4 }
 0x68f   : > { %v2349_v34 = vmul.f32 %v2304_v26, %v2223_v54  ;;  %v4548_v49 = vsel %vm1070_vm9, %v2859_v19, %v2897_v46  ;;  %v2863_v0 = vrot.slane %v2304_v26, %v4483_v6  ;;  %v2443_v18 = vadd.f32 %v2442_v47, %v2441_v38  ;;  %v2469_v38 = vld [vmem:[%s4699_s3] sm:$0xff] }
 0x690   : > { %v2391_v52 = vadd.f32 %v2390_v17, %v2389_v16  ;;  %v2396_v35 = vadd.f32 %v2395_v45, %v2394_v44  ;;  %v2401_v10 = vadd.f32 %v2400_v37, %v2399_v43  ;;  %v2456_v32 = vrot.slane %v2455_v11, 4 }
 0x691   : > { %v2413_v51 = vsel %vm273_vm0, %v2349_v34, 0.0  ;;  %v2258_v50 = vadd.f32 %v4184_v33, %v4480_v57  ;;  %v2412_v39 = vadd.f32 %v2411_v48, %v2410_v41  ;;  %v2444_v26 = vrot.slane %v2443_v18, 2 }
 0x692   : > { %v2494_v23 = vsel %vm1064_vm6, %v2391_v52, %v2493_v1  ;;  %v2397_v61 = vrot.slane %v2396_v35, 1  ;;  %v2309_v2 = vpop.permute.xlu1 %2308  ;;  %v2414_v4 = vrot.slane %v2413_v51, 4  ;;  %v2402_v31 = vrot.slane %v2401_v10, 2 }
 0x693   : > { %v2350_v12 = vmul.f32 %v2309_v2, %v2228_v40  ;;  %v2867_v8 = vrot.slane %v2309_v2, %v4483_v6  ;;  %v2248_v40 = vadd.f32 %v4180_v30, %v4480_v57  ;;  %v2887_v1 = vrot.slane %v4537_v58, %v4483_v6 }
 0x694   : > { %v2398_v24 = vadd.f32 %v2397_v61, %v2396_v35  ;;  %v2415_v53 = vadd.f32 %v2414_v4, %v2413_v51  ;;  %v2403_v59 = vadd.f32 %v2402_v31, %v2401_v10  ;;  %v2457_v34 = vadd.f32 %v2456_v32, %v2455_v11 }
 0x695   : > { %v2420_v21 = vsel %vm273_vm0, %v2350_v12, 0.0  ;;  %v2899_v55 = vsel %vm1058_vm3, %v2867_v8, %v2863_v0  ;;  %v2445_v12 = vadd.f32 %v2444_v26, %v2443_v18 }
 0x696   : > { %v2421_v5 = vrot.slane %v2420_v21, 4  ;;  %v2314_v13 = vpop.permute.xlu1 %2313  ;;  %v2495_v14 = vsel %vm1066_vm7, %v2398_v24, %v2494_v23  ;;  %v2416_v28 = vrot.slane %v2415_v53, 2  ;;  %v2404_v16 = vrot.slane %v2403_v59, 1 }
 0x697   : > { %v2351_v22 = vmul.f32 %v2314_v13, %v2233_v7  ;;  %v2871_v15 = vrot.slane %v2314_v13, %v4483_v6  ;;  %v2458_v8 = vrot.slane %v2457_v34, 2  ;;  %v2446_v13 = vrot.slane %v2445_v12, 1 }
 0x698   : > { %v2422_v54 = vadd.f32 %v2421_v5, %v2420_v21  ;;  %v2417_v42 = vadd.f32 %v2416_v28, %v2415_v53  ;;  %v2405_v19 = vadd.f32 %v2404_v16, %v2403_v59 }
 0x699   : > { %v2427_v27 = vsel %vm273_vm0, %v2351_v22, 0.0  ;;  %v2900_v44 = vsel %vm1060_vm4, %v2871_v15, %v2899_v55  ;;  %v2447_v16 = vadd.f32 %v2446_v13, %v2445_v12 }
 0x69a   : > { %v2423_v63 = vrot.slane %v2422_v54, 2  ;;  %v2428_v9 = vrot.slane %v2427_v27, 4  ;;  %v2319_v25 = vpop.permute.xlu1 %2318  ;;  %v2418_v17 = vrot.slane %v2417_v42, 1  ;;  %v2496_v57 = vsel %vm1068_vm8, %v2405_v19, %v2495_v14 }
 0x69b   : > { %v2352_v45 = vmul.f32 %v2319_v25, %v2238_v60  ;;  %v2875_v30 = vrot.slane %v2319_v25, %v4483_v6  ;;  %v2497_v51 = vsel %vm1070_vm9, %v2412_v39, %v2496_v57  ;;  %v2459_v14 = vadd.f32 %v2458_v8, %v2457_v34  ;;  %v2703_v34 = vld [vmem:[%s4700_s4 + $0x68] sm:$0xff]  ;;  %v3118_v8 = vld [vmem:[%s4700_s4 + $0x80] ss:$0 sm:$0xff] }
 0x69c   : > { %v2424_v43 = vadd.f32 %v2423_v63, %v2422_v54  ;;  %v2429_v46 = vadd.f32 %v2428_v9, %v2427_v27  ;;  %v2419_v58 = vadd.f32 %v2418_v17, %v2417_v42  ;;  %3113 = vmatmul.mubr.msk.f32.vlgmr.msra.gmra.mrb[34].mxu1 %vm273_vm0, %v2497_v51 }
 0x69d   : > { %v2434_v52 = vsel %vm273_vm0, %v2352_v45, 0.0  ;;  %v2901_v33 = vsel %vm1062_vm5, %v2875_v30, %v2900_v44  ;;  %2593 = vmatpush1.msra.mxu1 %v2469_v38  ;;  %2579 = vmatprep.mubr.f32.mxu1 %v3718_v56  ;;  %v2460_v42 = vrot.slane %v2459_v14, 1  ;;  %v3117_v38 = vld [vmem:[%s4699_s3 + $0x30] ss:$8 sm:$0x3] }
 0x69e   : > { %v2425_v35 = vrot.slane %v2424_v43, 1  ;;  %v2430_v62 = vrot.slane %v2429_v46, 2  ;;  %v2435_v37 = vrot.slane %v2434_v52, 4  ;;  %v2329_v0 = vpop.permute.xlu1 %2328  ;;  %v2902_v61 = vsel %vm1064_vm6, %v2879_v36, %v2901_v33  ;;  %v2704_v33 = vld [vmem:[%s4700_s4 + $0x70] sm:$0xff] }
 0x69f   : > { %v2354_v41 = vmul.f32 %v2329_v0, %v2248_v40  ;;  %v2883_v23 = vrot.slane %v2329_v0, %v4483_v6  ;;  %v2461_v25 = vadd.f32 %v2460_v42, %v2459_v14 }
 0x6a0   : > { %v2426_v2 = vadd.f32 %v2425_v35, %v2424_v43  ;;  %v2431_v10 = vadd.f32 %v2430_v62, %v2429_v46  ;;  %v2436_v4 = vadd.f32 %v2435_v37, %v2434_v52  ;;  %v265_v43 = vld [vmem:[%s245_s7 + $0x8] sm:$0xff]  ;;  %v2702_v46 = vld [vmem:[%s4700_s4 + $0x60] sm:$0xff]  ;;  %v2675_v35 = vrot.slane %v3117_v38, %v4078_v29 }
 0x6a1   : > { %v2448_v7 = vsel %vm273_vm0, %v2354_v41, 0.0  ;;  %v2903_v47 = vsel %vm1066_vm7, %v2883_v23, %v2902_v61  ;;  %v3545_v52 = vpack.c.bf16 %v2703_v34, %v2702_v46  ;;  %v2679_v62 = vrot.slane %v3117_v38, %v4398_v3  ;;  %v3119_v29 = vld [vmem:[%s4700_s4 + $0x88] ss:$0 sm:$0xff] }
 0x6a2   : > { %v2498_v24 = vsel %vm1058_vm3, %v2426_v2, %v2419_v58  ;;  %v2432_v11 = vrot.slane %v2431_v10, 1  ;;  %v2437_v31 = vrot.slane %v2436_v4, 2  ;;  %v2449_v20 = vrot.slane %v2448_v7, 4  ;;  %v2339_v53 = vpop.permute.xlu1 %2338 }
 0x6a3   : > { %v2356_v36 = vmul.f32 %v2339_v53, %v2258_v50  ;;  %v2891_v21 = vrot.slane %v2339_v53, %v4483_v6  ;;  %v2904_v55 = vsel %vm1068_vm8, %v2887_v1, %v2903_v47  ;;  %v264_v1 = vld [vmem:[%s245_s7] sm:$0xff]  ;;  %3546 = vmatprep.subr.bf16.mxu0 %v3545_v52  ;;  %s3004_s7 = sshll.u32 %s232_s6, 5  ;;  %vm2908_vm3 = vcmask 72712  }
 0x6a4   : > { %v2433_v60 = vadd.f32 %v2432_v11, %v2431_v10  ;;  %v2438_v48 = vadd.f32 %v2437_v31, %v2436_v4  ;;  %v2450_v5 = vadd.f32 %v2449_v20, %v2448_v7  ;;  %3548 = vmatpush3.bf16.msra.mxu0 %v3545_v52  ;;  %s234_s9 = scalar_lea.vmem [#allocation2], %s3004_s7 }
 0x6a5   : > { %v2462_v59 = vsel %vm273_vm0, %v2356_v36, 0.0  ;;  %v4594_v28 = vsel %vm1070_vm9, %v2891_v21, %v2904_v55  ;;  %s2926_s12 = sshll.u32 %s234_s9, 4  ;;  %s4651_s12 = int_to_ptr.vmem [resolvable:$true] %s2926_s12 }
 0x6a6   : > { %v2499_v22 = vsel %vm1060_vm4, %v2433_v60, %v2498_v24  ;;  %v2439_v15 = vrot.slane %v2438_v48, 1  ;;  %v2451_v40 = vrot.slane %v2450_v5, 2  ;;  %v2463_v18 = vrot.slane %v2462_v59, 4  ;;  %v3120_v60 = vld [vmem:[%s4700_s4 + $0x90] ss:$0 sm:$0xff]  ;;  %s3651_s17 = scalar_lea.vmem %s4651_s12, 512  ;;  %p3658_p1 = scmp.lt.s32.totalorder %s4651_s12, %s3656_s23 }
 0x6a7   : > { %p3652_p12 = scmp.ne.s32.totalorder %s4651_s12, %s3651_s17  ;;  %p3659_p2 = scmp.lt.s32.totalorder %s3657_s25, %s3651_s17 }
 0x6a8   : > { %v2440_v6 = vadd.f32 %v2439_v15, %v2438_v48  ;;  %v2452_v32 = vadd.f32 %v2451_v40, %v2450_v5  ;;  %v2464_v54 = vadd.f32 %v2463_v18, %v2462_v59 }
 0x6a9   : > { %p3653_p13 = pnand %p3652_p12, %p3791_p5  ;;  %p3660_p3 = por %p3659_p2, %p3658_p1 }
 0x6aa   : > { %v2453_v27 = vrot.slane %v2452_v32, 1  ;;  %v2465_v44 = vrot.slane %v2464_v54, 2  ;;  %v2500_v50 = vsel %vm1062_vm5, %v2440_v6, %v2499_v22 }
 0x6ab   : > { %v2501_v39 = vsel %vm1064_vm6, %v2447_v16, %v2500_v50  ;;  %p3654_p0 = pneg %p3653_p13 }
 0x6ac   : > { %v2454_v63 = vadd.f32 %v2453_v27, %v2452_v32  ;;  %v2466_v9 = vadd.f32 %v2465_v44, %v2464_v54 }
 0x6ad   : > { %p3661_p4 = pnand %p3660_p3, %p3654_p0 }
 0x6ae   : > { %v2467_v19 = vrot.slane %v2466_v9, 1  ;;  %v2502_v17 = vsel %vm1066_vm7, %v2454_v63, %v2501_v39 }
 0x6af   : > { %v2503_v45 = vsel %vm1068_vm8, %v2461_v25, %v2502_v17 }
 0x6b0   : > { %v2468_v30 = vadd.f32 %v2467_v19, %v2466_v9 }
 0x6b2   : > { %v2504_v26 = vsel %vm1070_vm9, %v2468_v30, %v2503_v45 }
 0x6b3   : > { %3114 = vmatmul.mubr.msk.f32.gmra.mrb[36].mxu1 %vm273_vm0, %v2504_v26  ;;  %vm2824_vm0 = vcmask 7168  }
 0x6b4   : > { %2656 = vmatprep.mubr.f32.mxu1 %v3718_v56 }
 0x6b7   : > { %3115 = vmatmul.mubr.msk.f32.vlgmr.msra.gmra.mrb[34].mxu1 %vm1936_vm12, %v264_v1 }
 0x6b8   : > { %2662 = vmatprep.mubr.f32.mxu1 %v3718_v56  ;;  %v2705_v56 = vld [vmem:[%s4700_s4 + $0x78] sm:$0xff] }
 0x6b9   : > { %v3549_v57 = vpack.c.bf16 %v2705_v56, %v2704_v33 }
 0x6bb   : > { %3116 = vmatmul.mubr.msk.f32.gmra.mrb[36].mxu1 %vm1936_vm12, %v265_v43  ;;  %3550 = vmatprep.subr.bf16.mxu0 %v3549_v57 }
 0x6bc   : > { %3552 = vmatpush3.bf16.msra.mxu0 %v3549_v57 }
 0x78a   : > { %v2658_v37 = vpop.f32.mrb[34].mxu1 }
 0x78b   : > { %v2682_v51 = vadd.f32 %v2675_v35, %v2658_v37  ;;  %v2660_v0 = vpop.f32.mrb[35].mxu1 }
 0x78c   : > { %v2683_v58 = vadd.f32 %v2679_v62, %v2660_v0 }
 0x78d   : > { %v2686_v41 = vmax.f32 %v2682_v51, 0.0 }
 0x78e   : > { %v2664_v23 = vpop.f32.mrb[36].mxu1  ;;  %v2687_v47 = vmax.f32 %v2683_v58, 0.0 }
 0x78f   : > { %v2684_v61 = vadd.f32 %v2675_v35, %v2664_v23  ;;  %v2666_v2 = vpop.f32.mrb[37].mxu1  ;;  %3462 = vmatprep.mubr.f32.mxu0 %v2686_v41 }
 0x790   : > { %v2685_v10 = vadd.f32 %v2679_v62, %v2666_v2  ;;  %v2809_v20 = vmul.f32 %v3119_v29, %v2687_v47 }
 0x791   : > { %v2688_v4 = vmax.f32 %v2684_v61, 0.0 }
 0x792   : > { %v2689_v12 = vmax.f32 %v2685_v10, 0.0 }
 0x793   : > { %3463 = vmatmul.mubr.f32.vlgmr.msra.gmra.mrb[48].mxu0 %v2688_v4 }
 0x794   : > { %v2810_v3 = vmul.f32 %v3119_v29, %v2689_v12 }
 0x866   : > { %v3464_v7 = vpop.f32.mrb[48].mxu0 }
 0x867   : > { %v2783_v24 = vadd.f32 %v3464_v7, %v3118_v8  ;;  %v2777_v11 = vpop.f32.mrb[49].mxu0 }
 0x868   : > { %v2778_v31 = vadd.f32 %v3118_v8, %v2777_v11 }
 0x869   : > { %2788 = vmax.xlane.f32.xlu1 %v2783_v24 }
 0x86a   : > { %2786 = vmax.xlane.f32.xlu0 %v2778_v31 }
 0x86d   : > { %2811 = vadd.xlane.f32.xlu1 %v2809_v20 }
 0x8f6   : > { %v2789_v53 = vpop.xlane.xlu1 %2788 }
 0x8f7   : > { %v2787_v36 = vpop.xlane.xlu0 %2786  ;;  %v2791_v21 = vsub.f32 %v2783_v24, %v2789_v53 }
 0x8f8   : > { %v2790_v55 = vsub.f32 %v2778_v31, %v2787_v36 }
 0x8f9   : > { %v2794_v14 = vmul.f32 1.442695, %v2791_v21 }
 0x8fa   : > { %v2792_v48 = vmul.f32 1.442695, %v2790_v55  ;;  %v2812_v5 = vpop.xlane.xlu1 %2811 }
 0x8fb   : > { %v2820_v13 = vadd.f32 %v3120_v60, %v2812_v5 }
 0x8fc   : > { %3643 = vpow2.f32 %v2792_v48 }
 0x8fd   : > { %2825 = vst.msk [vmem:[%s234_s9 + $0x8] sm:$0xff] %vm2824_vm0, %v2820_v13  ;;  %3645 = vpow2.f32 %v2794_v14 }
 0x8fe   : > { %2909 = vst.msk [vmem:[%s234_s9 + $0x8] sm:$0xff] %vm2908_vm3, %v4548_v49 }
 0x906   : > { %v3644_v59 = vpop.eup %3643 }
 0x907   : > { %2796 = vadd.xlane.f32.xlu0 %v3644_v59  ;;  %v3646_v22 = vpop.eup %3645 }
 0x90b   : > { %2798 = vadd.xlane.f32.xlu0 %v3646_v22 }
 0x90f   : > { %2813 = vadd.xlane.f32.xlu0 %v2810_v3 }
 0x994   : > { %v2797_v15 = vpop.xlane.xlu0 %2796 }
 0x995   : > { %3647 = vrcp.f32 %v2797_v15 }
 0x998   : > { %v2799_v40 = vpop.xlane.xlu0 %2798 }
 0x999   : > { %3649 = vrcp.f32 %v2799_v40 }
 0x99c   : > { %v2814_v18 = vpop.xlane.xlu0 %2813 }
 0x99d   : > { %v2821_v6 = vadd.f32 %v3120_v60, %v2814_v18 }
 0x99f   : > { %v3648_v32 = vpop.eup %3647  ;;  %2826 = vst.msk [vmem:[%s234_s9 + $0x18] sm:$0xff] %vm2824_vm0, %v2821_v6 }
 0x9a0   : > { %v2802_v54 = vmul.f32 %v3648_v32, %v3644_v59  ;;  %2910 = vst.msk [vmem:[%s234_s9 + $0x18] sm:$0xff] %vm2908_vm3, %v4594_v28 }
 0x9a2   : > { %2822 = vst [vmem:[%s234_s9] sm:$0xff] %v2802_v54 }
 0x9a3   : > { %v3650_v49 = vpop.eup %3649 }
 0x9a4   : > { %v2803_v16 = vmul.f32 %v3650_v49, %v3646_v22 }
 0x9a6   : > { %2823 = vst [vmem:[%s234_s9 + $0x10] sm:$0xff] %v2803_v16 }
 0x9a7   : > { %3664 = shalt.err (!%p3661_p4)
}
 0x9a8   : > { %s3665_s26 = scalar_lea.hbm %s4649_s15, 512  ;;  %s3669_s7 = scalar_lea.hbm %s4701_s5, 1024 }
 0x9a9   : > { %p3666_p7 = scmp.ne.s32.totalorder %s4649_s15, %s3665_s26  ;;  %p3670_p10 = scmp.lt.u32.totalorder %s4649_s15, %s4701_s5 }
 0x9aa   : > { %p3671_p11 = scmp.lt.u32.totalorder %s3669_s7, %s3665_s26  ;;  %p3673_p13 = scmp.lt.u32.totalorder %s3665_s26, %s4649_s15 }
 0x9ab   : > { %p3667_p8 = pnand %p3666_p7, %p3791_p5 }
 0x9ac   : > { %p3672_p12 = por %p3671_p11, %p3670_p10 }
 0x9ad   : > { %p3668_p9 = pneg %p3667_p8 }
 0x9ae   : > { %p3674_p0 = por %p3673_p13, %p3672_p12 }
 0x9b0   : > { %p3675_p1 = pnand %p3674_p0, %p3668_p9 }
 0x9b2   : > { %3678 = shalt.err (!%p3675_p1)
}
 0x9b3   : > { %s3721_s9 = smov 256   ;;  %s3722_s11 = smov 16  }
 0x9b4   : > { %3559 = dma.vmem_to_hbm [thread:$0]  (%p3791_p5), %s4651_s12, 512, %s4649_s15, %s4655_s16, %s3721_s9, %s3721_s9, %s3722_s11  }
 0x9b5 PF: > { %p3565_p2 = scmp.ge.s32.totalorder %s3713_s21, 2  ;;  %s2941_s13 = sand.u32 1, %s3701_s18  }
 0x9b6   : > { %s2942_s14 = scalar_lea.sflag [#allocation3], %s2941_s13 }
 0x9b7   : > { %p3562_p3 = pnand %p3565_p2, %p3795_p6 }
 0x9b9   : > { %3696 = dma.done.wait (!%p3562_p3), %s2942_s14, 512  }
 0x9ba   : > { %3698 = vsyncadd (!%p3562_p3), %s2942_s14, 4294966784  ;;  %p15_p4 = scmp.ge.s32.totalorder %s3778_s24, 4   ;;  %s4704_s18 = smov %s3705_s19 }
 0x9bb   : > { %s4705_s19 = smov %s3709_s20  ;;  %s4706_s20 = smov %s3789_s27 }
 0x9bc   : > { %s4707_s21 = smov %s3778_s24  ;;  %17 = sbr.rel (!%p15_p4) target bundleno = 3 (0x3), region = 79 }
 0x9c3   :  { %2947 = vsyncpa [#allocation3], 1 }
 0x9c4   :  { %2949 = vsyncpa [#allocation3 + $0x1], 1 }

</bundles_post_ra>
